<compile_context>
chip_gen: v7x
topology: tpu7x:2x2x1
jax: 0.10.0
libtpu: 0.0.40
codegen_flags: <defaults>
</compile_context>

<pallas_src>
import functools
import math

import jax
import jax.numpy as jnp
from jax.experimental import pallas as pl
from jax.experimental.pallas import tpu as pltpu


def encoder_layer_kernel(x_ref,
                         wqkv_ref, bqkv_ref, wo_ref, bo_ref,
                         w1_ref, b1_ref, w2_ref, b2_ref,
                         g1_ref, be1_ref, g2_ref, be2_ref,
                         o_ref, *, n_heads, seq_len, approx_recip):
    M, D = x_ref.shape                      # M = Bt * S (flattened rows)
    S = seq_len
    Bt = M // S
    H = n_heads
    hd = D // H
    f32, bf16 = jnp.float32, jnp.bfloat16

    x = x_ref[...]                          # (M, D) f32, kept for residuals
    xb = x.astype(bf16)

    # --- Fused QKV in-projection (1/sqrt(hd) pre-folded into Wq/bq upstream).
    qkv = jnp.dot(xb, wqkv_ref[...], preferred_element_type=f32) + bqkv_ref[...]
    # bf16 *before* any rearrangement -> halves relayout bytes / vreg pressure.
    qkv_b = qkv.astype(bf16).reshape(Bt, S, 3 * D)

    # --- Per-head attention; head-merge folded into Wo row-slices.
    #     No 4-D transposes, no head concat.  H is small -> static unrolled loop.
    # TODO(synk): for hd < 128, pack several heads per 128-lane group (or pad hd)
    #             so the MXU contraction dim is fully used.
    # TODO(synk): for long S, use a KV-blocked online-softmax inner loop so the
    #             (Bt, S, S) score tensor never blows VMEM.
    attn_acc = jnp.zeros((M, D), f32)
    for h in range(H):
        lo = h * hd
        qh = qkv_b[:, :, lo:lo + hd]                     # (Bt, S, hd) bf16
        kh = qkv_b[:, :, D + lo:D + lo + hd]
        vh = qkv_b[:, :, 2 * D + lo:2 * D + lo + hd]

        s = jnp.einsum('bqd,bkd->bqk', qh, kh, preferred_element_type=f32)
        s = s - jnp.max(s, axis=-1, keepdims=True)
        p = jnp.exp(s)
        denom = jnp.sum(p, axis=-1, keepdims=True)
        ah = jnp.einsum('bqk,bkd->bqd', p.astype(bf16), vh,
                        preferred_element_type=f32)      # (Bt, S, hd) f32
        if approx_recip:
            ah = ah * pl.reciprocal(denom, approx=True)  # EUP slot
        else:
            ah = ah / denom

        # Head merge == matmul against this head's rows of Wo, accumulated.
        attn_acc = attn_acc + jnp.dot(
            ah.reshape(M, hd).astype(bf16), wo_ref[lo:lo + hd, :],
            preferred_element_type=f32)

    attn = attn_acc + bo_ref[...]

    # --- Residual 1 + LayerNorm1 (dropout1 = identity in eval).
    h1 = x + attn
    mu1 = jnp.mean(h1, axis=-1, keepdims=True)
    var1 = jnp.mean(jnp.square(h1 - mu1), axis=-1, keepdims=True)
    n1 = (h1 - mu1) * jax.lax.rsqrt(var1 + 1e-5) * g1_ref[...] + be1_ref[...]

    # --- FFN: Linear1 -> ReLU -> Linear2 (inner dropout = identity).
    # TODO(synk): at production D/FF, tile F_hidden on a second "arbitrary" grid
    #             axis + f32 accumulator instead of holding full w1/w2 resident.
    f = jnp.dot(n1.astype(bf16), w1_ref[...], preferred_element_type=f32) + b1_ref[...]
    f = jnp.maximum(f, 0.0)
    f = jnp.dot(f.astype(bf16), w2_ref[...], preferred_element_type=f32) + b2_ref[...]

    # --- Residual 2 uses h1 (pre-norm1), as PredTrAD_v2 does, then LayerNorm2.
    h2 = h1 + f
    mu2 = jnp.mean(h2, axis=-1, keepdims=True)
    var2 = jnp.mean(jnp.square(h2 - mu2), axis=-1, keepdims=True)
    o_ref[...] = (h2 - mu2) * jax.lax.rsqrt(var2 + 1e-5) * g2_ref[...] + be2_ref[...]


def _tpu_config():
    """(vmem_limit_cap, activation_budget, mxu_align, multi_core) for this chip."""
    kind = ""
    try:
        kind = jax.devices()[0].device_kind.lower()
    except Exception:
        pass
    vmem_cap = None
    try:
        vmem_cap = int(pltpu.get_tpu_info().vmem_capacity_bytes)
    except Exception:
        vmem_cap = None
    if not vmem_cap:
        vmem_cap = (64 << 20) if "v7" in kind else (128 << 20)
    is_v5e = ("v5 lite" in kind) or ("v5e" in kind) or ("v5litepod" in kind)
    mxu_align = 128 if is_v5e else 256            # v5e MXU 4x128^2, else 2x256^2
    multi_core = any(t in kind for t in ("v4", "v5p", "v7"))
    vmem_limit_cap = (vmem_cap * 3) // 4          # ~25% headroom for compiler scratch
    act_budget = vmem_limit_cap // 3              # activations' share of the budget
    return vmem_limit_cap, act_budget, mxu_align, multi_core


def _pick_batch_tile(batch, seq, per_elem_bytes, budget_bytes, mxu_align, multi_core):
    """Divisor Bt of `batch` that fits the VMEM budget, gives legal (8,128)
    blocks, and prefers Bt*S aligned to the MXU native dim.  Keeps >= 2 grid
    steps only on multi-TensorCore chips (on 1-TC chips the grid is serial)."""
    divs = [d for d in range(1, batch + 1) if batch % d == 0]
    legal = [d for d in divs if (d * seq) % 8 == 0 or d == batch] or [batch]
    fitting = [d for d in legal if d * per_elem_bytes <= budget_bytes] or [min(legal)]
    aligned = [d for d in fitting if (d * seq) % mxu_align == 0]
    pool = aligned or fitting
    if multi_core and batch > 1:
        two_step = [d for d in pool if batch // d >= 2]
        if two_step:
            return max(two_step)
    return max(pool)


def prepare_params(params, n_heads):
    """One-time weight fusion / casting, hoisted out of the forward path.
    Fused (D, 3D) QKV weight with the 1/sqrt(hd) scale folded into the Q part;
    matmul weights in bf16 (f32 accumulation in-kernel), biases / LN in f32."""
    D = params["wq"].shape[0]
    hd = D // n_heads
    scale = 1.0 / math.sqrt(hd)
    f32, bf16 = jnp.float32, jnp.bfloat16
    wqkv = jnp.concatenate([params["wq"] * scale, params["wk"], params["wv"]],
                           axis=1).astype(bf16)
    bqkv = jnp.concatenate([params["bq"] * scale, params["bk"], params["bv"]],
                           axis=1).astype(f32)
    plist = [
        wqkv, bqkv,
        params["wo"].astype(bf16), params["bo"].astype(f32),
        params["w1"].astype(bf16), params["b1"].astype(f32),
        params["w2"].astype(bf16), params["b2"].astype(f32),
        params["g1"].astype(f32), params["be1"].astype(f32),
        params["g2"].astype(f32), params["be2"].astype(f32),
    ]
    return [jax.block_until_ready(p) for p in plist]


def _build_call(n_rows_total, D, rows_per_block, param_list, *, n_heads, seq_len,
                vmem_limit, cost, single_buffer_params, approx_recip):
    grid = (n_rows_total // rows_per_block,)

    def param_spec(p):
        if single_buffer_params:
            # Constant block index across the grid: double-buffering buys
            # nothing, single-buffer to halve resident weight VMEM (v7x).
            return pl.BlockSpec(p.shape, lambda b: (0,) * p.ndim,
                                pipeline_mode=pl.Buffered(1))
        return pl.BlockSpec(p.shape, lambda b: (0,) * p.ndim)

    in_specs = [pl.BlockSpec((rows_per_block, D), lambda b: (b, 0))]
    in_specs += [param_spec(p) for p in param_list]
    out_spec = pl.BlockSpec((rows_per_block, D), lambda b: (b, 0))

    kernel = functools.partial(encoder_layer_kernel, n_heads=n_heads,
                               seq_len=seq_len, approx_recip=approx_recip)

    # TODO(synk): on v7x, verify the batch grid axis actually shards across both
    # TensorCores; if one TC idles, switch to pltpu.CORE_PARALLEL / pl.core_map.
    return pl.pallas_call(
        kernel,
        out_shape=jax.ShapeDtypeStruct((n_rows_total, D), jnp.float32),
        grid_spec=pltpu.PrefetchScalarGridSpec(
            num_scalar_prefetch=0,
            grid=grid,
            in_specs=in_specs,
            out_specs=out_spec),
        compiler_params=pltpu.CompilerParams(
            dimension_semantics=("parallel",),
            vmem_limit_bytes=vmem_limit),
        cost_estimate=cost,
    )


def transformer_encoder_layer(x, prepared_params, n_heads, *, approx_recip=True):
    B, S, D = x.shape
    assert D % n_heads == 0
    F_hidden = prepared_params[4].shape[1]          # w1 is (D, F)

    vmem_cap, act_budget, mxu_align, multi_core = _tpu_config()

    # Rough per-batch-element f32 working set of the kernel body.
    per_elem_bytes = 4 * (10 * S * D + 4 * S * S + 2 * S * F_hidden)
    Bt = _pick_batch_tile(B, S, per_elem_bytes, act_budget, mxu_align, multi_core)
    rows = Bt * S

    def nbytes(a):
        return int(a.size) * jnp.dtype(a.dtype).itemsize

    param_bytes = sum(nbytes(p) for p in prepared_params)
    io_bytes = 2 * 2 * rows * D * 4                 # in + out blocks, double-buffered
    need = int(1.3 * (param_bytes + io_bytes + Bt * per_elem_bytes))
    vmem_limit = int(max(16 << 20, min(need, vmem_cap)))

    flops = int(2 * B * S * D * (3 * D + D + 2 * F_hidden) + 4 * B * S * S * D)
    cost = pl.CostEstimate(
        flops=flops,
        transcendentals=int(B * n_heads * S * S),
        bytes_accessed=int(2 * B * S * D * 4 + param_bytes))

    # Pre-flattened activations: sublane-dense DMAs, no in-kernel reshape of x.
    # TODO(synk): accept/emit bf16 activations if downstream tolerates it
    # (halves activation HBM traffic; this kernel is memory-bound at small D).
    x2d = x.reshape(B * S, D).astype(jnp.float32)

    build = functools.partial(
        _build_call, B * S, D, rows, prepared_params, n_heads=n_heads,
        seq_len=S, vmem_limit=vmem_limit, cost=cost, approx_recip=approx_recip)
    try:
        out2d = build(single_buffer_params=hasattr(pl, "Buffered"))(
            x2d, *prepared_params)
    except Exception:
        # Fallback for jax versions without BlockSpec pipeline_mode / Buffered(1).
        out2d = build(single_buffer_params=False)(x2d, *prepared_params)
    return out2d.reshape(B, S, D)


def reference_forward(x, params, n_heads):
    """Pure-JAX f32 reference with identical (PredTrAD_v2) semantics."""
    B, S, D = x.shape
    hd = D // n_heads
    scale = 1.0 / math.sqrt(hd)

    def proj(t, w, b):
        return jnp.einsum('bsd,df->bsf', t, w) + b

    q = proj(x, params["wq"], params["bq"]) * scale
    k = proj(x, params["wk"], params["bk"])
    v = proj(x, params["wv"], params["bv"])

    def heads(t):
        return t.reshape(B, S, n_heads, hd).transpose(0, 2, 1, 3)

    q, k, v = heads(q), heads(k), heads(v)
    s = jnp.einsum('bhqd,bhkd->bhqk', q, k)
    p = jax.nn.softmax(s, axis=-1)
    attn = jnp.einsum('bhqk,bhkd->bhqd', p, v)
    attn = attn.transpose(0, 2, 1, 3).reshape(B, S, D)
    attn = proj(attn, params["wo"], params["bo"])

    def ln(t, g, b):
        mu = jnp.mean(t, axis=-1, keepdims=True)
        var = jnp.mean(jnp.square(t - mu), axis=-1, keepdims=True)
        return (t - mu) * jax.lax.rsqrt(var + 1e-5) * g + b

    h1 = x + attn
    n1 = ln(h1, params["g1"], params["be1"])
    f = jnp.maximum(proj(n1, params["w1"], params["b1"]), 0.0)
    f = proj(f, params["w2"], params["b2"])
    return ln(h1 + f, params["g2"], params["be2"])


def init_params(key, model_dim, n_heads, ff_hidden_dim):
    # Deterministic synthetic init. Linear weights stored already transposed
    # (in_dim, out_dim) so the kernel computes x @ W + b.
    ks = jax.random.split(key, 8)
    D, F = model_dim, ff_hidden_dim
    s = 0.1
    return {
        "wq": s * jax.random.normal(ks[0], (D, D), jnp.float32),
        "wk": s * jax.random.normal(ks[1], (D, D), jnp.float32),
        "wv": s * jax.random.normal(ks[2], (D, D), jnp.float32),
        "bq": s * jax.random.normal(ks[3], (1, D), jnp.float32),
        "bk": jnp.zeros((1, D), jnp.float32),
        "bv": jnp.zeros((1, D), jnp.float32),
        "wo": s * jax.random.normal(ks[4], (D, D), jnp.float32),
        "bo": jnp.zeros((1, D), jnp.float32),
        "w1": s * jax.random.normal(ks[5], (D, F), jnp.float32),
        "b1": jnp.zeros((1, F), jnp.float32),
        "w2": s * jax.random.normal(ks[6], (F, D), jnp.float32),
        "b2": jnp.zeros((1, D), jnp.float32),
        "g1": jnp.ones((1, D), jnp.float32),
        "be1": jnp.zeros((1, D), jnp.float32),
        "g2": jnp.ones((1, D), jnp.float32),
        "be2": jnp.zeros((1, D), jnp.float32),
    }


if __name__ == "__main__":
    B, S, D, H, FF = 2, 8, 32, 4, 64

    key = jax.random.PRNGKey(0)
    kx, kp = jax.random.split(key)
    x = jax.random.normal(kx, (B, S, D), jnp.float32)
    params = init_params(kp, D, H, FF)

    fused = prepare_params(params, n_heads=H)    # one-time prep, hoisted out
    out = transformer_encoder_layer(x, fused, n_heads=H)
    out = jax.block_until_ready(out)

    ref = reference_forward(x, params, n_heads=H)

    assert out.shape == (B, S, D)
    assert bool(jnp.all(jnp.isfinite(out)))
    # bf16 MXU inputs + approx softmax reciprocal vs. an f32 reference.
    err = float(jnp.max(jnp.abs(out - ref)))
    assert err < 5e-2, f"max abs error {err}"
    print("KERNEL_OK")
</pallas_src>

<mosaic_0001>
module attributes {stable_mosaic.version = 11 : i64} {
  func.func @encoder_layer_kernel(%arg0: i32, %arg1: memref<16x32xf32, #tpu.memory_space<vmem>>, %arg2: memref<32x96xbf16, #tpu.memory_space<vmem>>, %arg3: memref<1x96xf32, #tpu.memory_space<vmem>>, %arg4: memref<32x32xbf16, #tpu.memory_space<vmem>>, %arg5: memref<1x32xf32, #tpu.memory_space<vmem>>, %arg6: memref<32x64xbf16, #tpu.memory_space<vmem>>, %arg7: memref<1x64xf32, #tpu.memory_space<vmem>>, %arg8: memref<64x32xbf16, #tpu.memory_space<vmem>>, %arg9: memref<1x32xf32, #tpu.memory_space<vmem>>, %arg10: memref<1x32xf32, #tpu.memory_space<vmem>>, %arg11: memref<1x32xf32, #tpu.memory_space<vmem>>, %arg12: memref<1x32xf32, #tpu.memory_space<vmem>>, %arg13: memref<1x32xf32, #tpu.memory_space<vmem>>, %arg14: memref<16x32xf32, #tpu.memory_space<vmem>>) attributes {dimension_semantics = [#tpu.dimension_semantics<parallel>], iteration_bounds = array<i64: 1>, scalar_prefetch = 0 : i64, scratch_operands = 0 : i64, tpu.core_type = #tpu.core_type<tc>, window_params = [{transform_indices = @transform_0, window_bounds = array<i64: 16, 32>}, {pipeline_mode = #tpu.pipeline_mode<synchronous>, transform_indices = @transform_1, window_bounds = array<i64: 32, 96>}, {pipeline_mode = #tpu.pipeline_mode<synchronous>, transform_indices = @transform_2, window_bounds = array<i64: 1, 96>}, {pipeline_mode = #tpu.pipeline_mode<synchronous>, transform_indices = @transform_3, window_bounds = array<i64: 32, 32>}, {pipeline_mode = #tpu.pipeline_mode<synchronous>, transform_indices = @transform_4, window_bounds = array<i64: 1, 32>}, {pipeline_mode = #tpu.pipeline_mode<synchronous>, transform_indices = @transform_5, window_bounds = array<i64: 32, 64>}, {pipeline_mode = #tpu.pipeline_mode<synchronous>, transform_indices = @transform_6, window_bounds = array<i64: 1, 64>}, {pipeline_mode = #tpu.pipeline_mode<synchronous>, transform_indices = @transform_7, window_bounds = array<i64: 64, 32>}, {pipeline_mode = #tpu.pipeline_mode<synchronous>, transform_indices = @transform_8, window_bounds = array<i64: 1, 32>}, {pipeline_mode = #tpu.pipeline_mode<synchronous>, transform_indices = @transform_9, window_bounds = array<i64: 1, 32>}, {pipeline_mode = #tpu.pipeline_mode<synchronous>, transform_indices = @transform_10, window_bounds = array<i64: 1, 32>}, {pipeline_mode = #tpu.pipeline_mode<synchronous>, transform_indices = @transform_11, window_bounds = array<i64: 1, 32>}, {pipeline_mode = #tpu.pipeline_mode<synchronous>, transform_indices = @transform_12, window_bounds = array<i64: 1, 32>}, {transform_indices = @transform_13, window_bounds = array<i64: 16, 32>}]} {
    %c0 = arith.constant 0 : index
    %c0_0 = arith.constant 0 : index
    %0 = vector.load %arg1[%c0, %c0_0] : memref<16x32xf32, #tpu.memory_space<vmem>>, vector<16x32xf32>
    %1 = arith.truncf %0 : vector<16x32xf32> to vector<16x32xbf16>
    %c0_1 = arith.constant 0 : index
    %c0_2 = arith.constant 0 : index
    %2 = vector.load %arg2[%c0_1, %c0_2] : memref<32x96xbf16, #tpu.memory_space<vmem>>, vector<32x96xbf16>
    %cst = arith.constant dense<0.000000e+00> : vector<16x96xf32>
    %3 = tpu.matmul %1, %2, %cst {dimension_numbers = #tpu.dot_dimension_numbers<[1], [0], [0], [1], [0, 0, 1, 1], [], []>} : vector<16x32xbf16>, vector<32x96xbf16>, vector<16x96xf32> -> vector<16x96xf32>
    %c0_3 = arith.constant 0 : index
    %c0_4 = arith.constant 0 : index
    %4 = vector.load %arg3[%c0_3, %c0_4] : memref<1x96xf32, #tpu.memory_space<vmem>>, vector<1x96xf32>
    %5 = vector.broadcast %4 : vector<1x96xf32> to vector<16x96xf32>
    %6 = arith.addf %3, %5 : vector<16x96xf32>
    %7 = arith.truncf %6 : vector<16x96xf32> to vector<16x96xbf16>
    %8 = vector.shape_cast %7 : vector<16x96xbf16> to vector<2x8x96xbf16>
    %cst_5 = arith.constant 0.000000e+00 : f32
    %9 = vector.broadcast %cst_5 : f32 to vector<16x32xf32>
    %10 = vector.extract_strided_slice %8 {offsets = [0, 0, 0], sizes = [2, 8, 8], strides = [1, 1, 1]} : vector<2x8x96xbf16> to vector<2x8x8xbf16>
    %11 = vector.extract_strided_slice %8 {offsets = [0, 0, 32], sizes = [2, 8, 8], strides = [1, 1, 1]} : vector<2x8x96xbf16> to vector<2x8x8xbf16>
    %12 = vector.extract_strided_slice %8 {offsets = [0, 0, 64], sizes = [2, 8, 8], strides = [1, 1, 1]} : vector<2x8x96xbf16> to vector<2x8x8xbf16>
    "tpu.trace_start"() <{level = 10 : i32, message = "bqd,bkd->bqk"}> : () -> ()
    %cst_6 = arith.constant dense<0.000000e+00> : vector<2x8x8xf32>
    %13 = tpu.matmul %10, %11, %cst_6 {dimension_numbers = #tpu.dot_dimension_numbers<[2], [2], [1], [1], [0, 0, 0, 1, 1, 1], [0], [0]>} : vector<2x8x8xbf16>, vector<2x8x8xbf16>, vector<2x8x8xf32> -> vector<2x8x8xf32>
    "tpu.trace_stop"() : () -> ()
    %cst_7 = arith.constant dense<0xFF800000> : vector<2x8xf32>
    %14 = vector.multi_reduction <maximumf>, %13, %cst_7 [2] : vector<2x8x8xf32> to vector<2x8xf32>
    %15 = vector.shape_cast %14 : vector<2x8xf32> to vector<2x8x1xf32>
    %16 = vector.broadcast %15 : vector<2x8x1xf32> to vector<2x8x8xf32>
    %17 = arith.subf %13, %16 : vector<2x8x8xf32>
    %18 = math.exp %17 : vector<2x8x8xf32>
    %cst_8 = arith.constant dense<0.000000e+00> : vector<2x8xf32>
    %19 = vector.multi_reduction <add>, %18, %cst_8 [2] : vector<2x8x8xf32> to vector<2x8xf32>
    %20 = vector.shape_cast %19 : vector<2x8xf32> to vector<2x8x1xf32>
    %21 = arith.truncf %18 : vector<2x8x8xf32> to vector<2x8x8xbf16>
    "tpu.trace_start"() <{level = 10 : i32, message = "bqk,bkd->bqd"}> : () -> ()
    %cst_9 = arith.constant dense<0.000000e+00> : vector<2x8x8xf32>
    %22 = tpu.matmul %21, %12, %cst_9 {dimension_numbers = #tpu.dot_dimension_numbers<[2], [1], [1], [2], [0, 0, 0, 1, 1, 2], [0], [0]>} : vector<2x8x8xbf16>, vector<2x8x8xbf16>, vector<2x8x8xf32> -> vector<2x8x8xf32>
    "tpu.trace_stop"() : () -> ()
    %23 = tpu.reciprocal %20 {approx = true} : vector<2x8x1xf32> -> vector<2x8x1xf32>
    %24 = vector.broadcast %23 : vector<2x8x1xf32> to vector<2x8x8xf32>
    %25 = arith.mulf %22, %24 : vector<2x8x8xf32>
    %26 = vector.shape_cast %25 : vector<2x8x8xf32> to vector<16x8xf32>
    %27 = arith.truncf %26 : vector<16x8xf32> to vector<16x8xbf16>
    %c0_10 = arith.constant 0 : index
    %c0_11 = arith.constant 0 : index
    %28 = vector.load %arg4[%c0_10, %c0_11] : memref<32x32xbf16, #tpu.memory_space<vmem>>, vector<8x32xbf16>
    %cst_12 = arith.constant dense<0.000000e+00> : vector<16x32xf32>
    %29 = tpu.matmul %27, %28, %cst_12 {dimension_numbers = #tpu.dot_dimension_numbers<[1], [0], [0], [1], [0, 0, 1, 1], [], []>} : vector<16x8xbf16>, vector<8x32xbf16>, vector<16x32xf32> -> vector<16x32xf32>
    %30 = arith.addf %9, %29 : vector<16x32xf32>
    %31 = vector.extract_strided_slice %8 {offsets = [0, 0, 8], sizes = [2, 8, 8], strides = [1, 1, 1]} : vector<2x8x96xbf16> to vector<2x8x8xbf16>
    %32 = vector.extract_strided_slice %8 {offsets = [0, 0, 40], sizes = [2, 8, 8], strides = [1, 1, 1]} : vector<2x8x96xbf16> to vector<2x8x8xbf16>
    %33 = vector.extract_strided_slice %8 {offsets = [0, 0, 72], sizes = [2, 8, 8], strides = [1, 1, 1]} : vector<2x8x96xbf16> to vector<2x8x8xbf16>
    "tpu.trace_start"() <{level = 10 : i32, message = "bqd,bkd->bqk"}> : () -> ()
    %cst_13 = arith.constant dense<0.000000e+00> : vector<2x8x8xf32>
    %34 = tpu.matmul %31, %32, %cst_13 {dimension_numbers = #tpu.dot_dimension_numbers<[2], [2], [1], [1], [0, 0, 0, 1, 1, 1], [0], [0]>} : vector<2x8x8xbf16>, vector<2x8x8xbf16>, vector<2x8x8xf32> -> vector<2x8x8xf32>
    "tpu.trace_stop"() : () -> ()
    %cst_14 = arith.constant dense<0xFF800000> : vector<2x8xf32>
    %35 = vector.multi_reduction <maximumf>, %34, %cst_14 [2] : vector<2x8x8xf32> to vector<2x8xf32>
    %36 = vector.shape_cast %35 : vector<2x8xf32> to vector<2x8x1xf32>
    %37 = vector.broadcast %36 : vector<2x8x1xf32> to vector<2x8x8xf32>
    %38 = arith.subf %34, %37 : vector<2x8x8xf32>
    %39 = math.exp %38 : vector<2x8x8xf32>
    %cst_15 = arith.constant dense<0.000000e+00> : vector<2x8xf32>
    %40 = vector.multi_reduction <add>, %39, %cst_15 [2] : vector<2x8x8xf32> to vector<2x8xf32>
    %41 = vector.shape_cast %40 : vector<2x8xf32> to vector<2x8x1xf32>
    %42 = arith.truncf %39 : vector<2x8x8xf32> to vector<2x8x8xbf16>
    "tpu.trace_start"() <{level = 10 : i32, message = "bqk,bkd->bqd"}> : () -> ()
    %cst_16 = arith.constant dense<0.000000e+00> : vector<2x8x8xf32>
    %43 = tpu.matmul %42, %33, %cst_16 {dimension_numbers = #tpu.dot_dimension_numbers<[2], [1], [1], [2], [0, 0, 0, 1, 1, 2], [0], [0]>} : vector<2x8x8xbf16>, vector<2x8x8xbf16>, vector<2x8x8xf32> -> vector<2x8x8xf32>
    "tpu.trace_stop"() : () -> ()
    %44 = tpu.reciprocal %41 {approx = true} : vector<2x8x1xf32> -> vector<2x8x1xf32>
    %45 = vector.broadcast %44 : vector<2x8x1xf32> to vector<2x8x8xf32>
    %46 = arith.mulf %43, %45 : vector<2x8x8xf32>
    %47 = vector.shape_cast %46 : vector<2x8x8xf32> to vector<16x8xf32>
    %48 = arith.truncf %47 : vector<16x8xf32> to vector<16x8xbf16>
    %c8 = arith.constant 8 : index
    %c0_17 = arith.constant 0 : index
    %49 = vector.load %arg4[%c8, %c0_17] : memref<32x32xbf16, #tpu.memory_space<vmem>>, vector<8x32xbf16>
    %cst_18 = arith.constant dense<0.000000e+00> : vector<16x32xf32>
    %50 = tpu.matmul %48, %49, %cst_18 {dimension_numbers = #tpu.dot_dimension_numbers<[1], [0], [0], [1], [0, 0, 1, 1], [], []>} : vector<16x8xbf16>, vector<8x32xbf16>, vector<16x32xf32> -> vector<16x32xf32>
    %51 = arith.addf %30, %50 : vector<16x32xf32>
    %52 = vector.extract_strided_slice %8 {offsets = [0, 0, 16], sizes = [2, 8, 8], strides = [1, 1, 1]} : vector<2x8x96xbf16> to vector<2x8x8xbf16>
    %53 = vector.extract_strided_slice %8 {offsets = [0, 0, 48], sizes = [2, 8, 8], strides = [1, 1, 1]} : vector<2x8x96xbf16> to vector<2x8x8xbf16>
    %54 = vector.extract_strided_slice %8 {offsets = [0, 0, 80], sizes = [2, 8, 8], strides = [1, 1, 1]} : vector<2x8x96xbf16> to vector<2x8x8xbf16>
    "tpu.trace_start"() <{level = 10 : i32, message = "bqd,bkd->bqk"}> : () -> ()
    %cst_19 = arith.constant dense<0.000000e+00> : vector<2x8x8xf32>
    %55 = tpu.matmul %52, %53, %cst_19 {dimension_numbers = #tpu.dot_dimension_numbers<[2], [2], [1], [1], [0, 0, 0, 1, 1, 1], [0], [0]>} : vector<2x8x8xbf16>, vector<2x8x8xbf16>, vector<2x8x8xf32> -> vector<2x8x8xf32>
    "tpu.trace_stop"() : () -> ()
    %cst_20 = arith.constant dense<0xFF800000> : vector<2x8xf32>
    %56 = vector.multi_reduction <maximumf>, %55, %cst_20 [2] : vector<2x8x8xf32> to vector<2x8xf32>
    %57 = vector.shape_cast %56 : vector<2x8xf32> to vector<2x8x1xf32>
    %58 = vector.broadcast %57 : vector<2x8x1xf32> to vector<2x8x8xf32>
    %59 = arith.subf %55, %58 : vector<2x8x8xf32>
    %60 = math.exp %59 : vector<2x8x8xf32>
    %cst_21 = arith.constant dense<0.000000e+00> : vector<2x8xf32>
    %61 = vector.multi_reduction <add>, %60, %cst_21 [2] : vector<2x8x8xf32> to vector<2x8xf32>
    %62 = vector.shape_cast %61 : vector<2x8xf32> to vector<2x8x1xf32>
    %63 = arith.truncf %60 : vector<2x8x8xf32> to vector<2x8x8xbf16>
    "tpu.trace_start"() <{level = 10 : i32, message = "bqk,bkd->bqd"}> : () -> ()
    %cst_22 = arith.constant dense<0.000000e+00> : vector<2x8x8xf32>
    %64 = tpu.matmul %63, %54, %cst_22 {dimension_numbers = #tpu.dot_dimension_numbers<[2], [1], [1], [2], [0, 0, 0, 1, 1, 2], [0], [0]>} : vector<2x8x8xbf16>, vector<2x8x8xbf16>, vector<2x8x8xf32> -> vector<2x8x8xf32>
    "tpu.trace_stop"() : () -> ()
    %65 = tpu.reciprocal %62 {approx = true} : vector<2x8x1xf32> -> vector<2x8x1xf32>
    %66 = vector.broadcast %65 : vector<2x8x1xf32> to vector<2x8x8xf32>
    %67 = arith.mulf %64, %66 : vector<2x8x8xf32>
    %68 = vector.shape_cast %67 : vector<2x8x8xf32> to vector<16x8xf32>
    %69 = arith.truncf %68 : vector<16x8xf32> to vector<16x8xbf16>
    %c16 = arith.constant 16 : index
    %c0_23 = arith.constant 0 : index
    %70 = vector.load %arg4[%c16, %c0_23] : memref<32x32xbf16, #tpu.memory_space<vmem>>, vector<8x32xbf16>
    %cst_24 = arith.constant dense<0.000000e+00> : vector<16x32xf32>
    %71 = tpu.matmul %69, %70, %cst_24 {dimension_numbers = #tpu.dot_dimension_numbers<[1], [0], [0], [1], [0, 0, 1, 1], [], []>} : vector<16x8xbf16>, vector<8x32xbf16>, vector<16x32xf32> -> vector<16x32xf32>
    %72 = arith.addf %51, %71 : vector<16x32xf32>
    %73 = vector.extract_strided_slice %8 {offsets = [0, 0, 24], sizes = [2, 8, 8], strides = [1, 1, 1]} : vector<2x8x96xbf16> to vector<2x8x8xbf16>
    %74 = vector.extract_strided_slice %8 {offsets = [0, 0, 56], sizes = [2, 8, 8], strides = [1, 1, 1]} : vector<2x8x96xbf16> to vector<2x8x8xbf16>
    %75 = vector.extract_strided_slice %8 {offsets = [0, 0, 88], sizes = [2, 8, 8], strides = [1, 1, 1]} : vector<2x8x96xbf16> to vector<2x8x8xbf16>
    "tpu.trace_start"() <{level = 10 : i32, message = "bqd,bkd->bqk"}> : () -> ()
    %cst_25 = arith.constant dense<0.000000e+00> : vector<2x8x8xf32>
    %76 = tpu.matmul %73, %74, %cst_25 {dimension_numbers = #tpu.dot_dimension_numbers<[2], [2], [1], [1], [0, 0, 0, 1, 1, 1], [0], [0]>} : vector<2x8x8xbf16>, vector<2x8x8xbf16>, vector<2x8x8xf32> -> vector<2x8x8xf32>
    "tpu.trace_stop"() : () -> ()
    %cst_26 = arith.constant dense<0xFF800000> : vector<2x8xf32>
    %77 = vector.multi_reduction <maximumf>, %76, %cst_26 [2] : vector<2x8x8xf32> to vector<2x8xf32>
    %78 = vector.shape_cast %77 : vector<2x8xf32> to vector<2x8x1xf32>
    %79 = vector.broadcast %78 : vector<2x8x1xf32> to vector<2x8x8xf32>
    %80 = arith.subf %76, %79 : vector<2x8x8xf32>
    %81 = math.exp %80 : vector<2x8x8xf32>
    %cst_27 = arith.constant dense<0.000000e+00> : vector<2x8xf32>
    %82 = vector.multi_reduction <add>, %81, %cst_27 [2] : vector<2x8x8xf32> to vector<2x8xf32>
    %83 = vector.shape_cast %82 : vector<2x8xf32> to vector<2x8x1xf32>
    %84 = arith.truncf %81 : vector<2x8x8xf32> to vector<2x8x8xbf16>
    "tpu.trace_start"() <{level = 10 : i32, message = "bqk,bkd->bqd"}> : () -> ()
    %cst_28 = arith.constant dense<0.000000e+00> : vector<2x8x8xf32>
    %85 = tpu.matmul %84, %75, %cst_28 {dimension_numbers = #tpu.dot_dimension_numbers<[2], [1], [1], [2], [0, 0, 0, 1, 1, 2], [0], [0]>} : vector<2x8x8xbf16>, vector<2x8x8xbf16>, vector<2x8x8xf32> -> vector<2x8x8xf32>
    "tpu.trace_stop"() : () -> ()
    %86 = tpu.reciprocal %83 {approx = true} : vector<2x8x1xf32> -> vector<2x8x1xf32>
    %87 = vector.broadcast %86 : vector<2x8x1xf32> to vector<2x8x8xf32>
    %88 = arith.mulf %85, %87 : vector<2x8x8xf32>
    %89 = vector.shape_cast %88 : vector<2x8x8xf32> to vector<16x8xf32>
    %90 = arith.truncf %89 : vector<16x8xf32> to vector<16x8xbf16>
    %c24 = arith.constant 24 : index
    %c0_29 = arith.constant 0 : index
    %91 = vector.load %arg4[%c24, %c0_29] : memref<32x32xbf16, #tpu.memory_space<vmem>>, vector<8x32xbf16>
    %cst_30 = arith.constant dense<0.000000e+00> : vector<16x32xf32>
    %92 = tpu.matmul %90, %91, %cst_30 {dimension_numbers = #tpu.dot_dimension_numbers<[1], [0], [0], [1], [0, 0, 1, 1], [], []>} : vector<16x8xbf16>, vector<8x32xbf16>, vector<16x32xf32> -> vector<16x32xf32>
    %93 = arith.addf %72, %92 : vector<16x32xf32>
    %c0_31 = arith.constant 0 : index
    %c0_32 = arith.constant 0 : index
    %94 = vector.load %arg5[%c0_31, %c0_32] : memref<1x32xf32, #tpu.memory_space<vmem>>, vector<1x32xf32>
    %95 = vector.broadcast %94 : vector<1x32xf32> to vector<16x32xf32>
    %96 = arith.addf %93, %95 : vector<16x32xf32>
    %97 = arith.addf %0, %96 : vector<16x32xf32>
    %cst_33 = arith.constant dense<0.000000e+00> : vector<16xf32>
    %98 = vector.multi_reduction <add>, %97, %cst_33 [1] : vector<16x32xf32> to vector<16xf32>
    %99 = vector.shape_cast %98 : vector<16xf32> to vector<16x1xf32>
    %cst_34 = arith.constant 3.200000e+01 : f32
    %100 = vector.broadcast %cst_34 : f32 to vector<16x1xf32>
    %101 = arith.divf %99, %100 : vector<16x1xf32>
    %102 = vector.broadcast %101 : vector<16x1xf32> to vector<16x32xf32>
    %103 = arith.subf %97, %102 : vector<16x32xf32>
    %104 = arith.mulf %103, %103 : vector<16x32xf32>
    %cst_35 = arith.constant dense<0.000000e+00> : vector<16xf32>
    %105 = vector.multi_reduction <add>, %104, %cst_35 [1] : vector<16x32xf32> to vector<16xf32>
    %106 = vector.shape_cast %105 : vector<16xf32> to vector<16x1xf32>
    %cst_36 = arith.constant 3.200000e+01 : f32
    %107 = vector.broadcast %cst_36 : f32 to vector<16x1xf32>
    %108 = arith.divf %106, %107 : vector<16x1xf32>
    %109 = vector.broadcast %101 : vector<16x1xf32> to vector<16x32xf32>
    %110 = arith.subf %97, %109 : vector<16x32xf32>
    %cst_37 = arith.constant 9.99999974E-6 : f32
    %111 = vector.broadcast %cst_37 : f32 to vector<16x1xf32>
    %112 = arith.addf %108, %111 : vector<16x1xf32>
    %113 = math.rsqrt %112 : vector<16x1xf32>
    %114 = vector.broadcast %113 : vector<16x1xf32> to vector<16x32xf32>
    %115 = arith.mulf %110, %114 : vector<16x32xf32>
    %c0_38 = arith.constant 0 : index
    %c0_39 = arith.constant 0 : index
    %116 = vector.load %arg10[%c0_38, %c0_39] : memref<1x32xf32, #tpu.memory_space<vmem>>, vector<1x32xf32>
    %117 = vector.broadcast %116 : vector<1x32xf32> to vector<16x32xf32>
    %118 = arith.mulf %115, %117 : vector<16x32xf32>
    %c0_40 = arith.constant 0 : index
    %c0_41 = arith.constant 0 : index
    %119 = vector.load %arg11[%c0_40, %c0_41] : memref<1x32xf32, #tpu.memory_space<vmem>>, vector<1x32xf32>
    %120 = vector.broadcast %119 : vector<1x32xf32> to vector<16x32xf32>
    %121 = arith.addf %118, %120 : vector<16x32xf32>
    %122 = arith.truncf %121 : vector<16x32xf32> to vector<16x32xbf16>
    %c0_42 = arith.constant 0 : index
    %c0_43 = arith.constant 0 : index
    %123 = vector.load %arg6[%c0_42, %c0_43] : memref<32x64xbf16, #tpu.memory_space<vmem>>, vector<32x64xbf16>
    %cst_44 = arith.constant dense<0.000000e+00> : vector<16x64xf32>
    %124 = tpu.matmul %122, %123, %cst_44 {dimension_numbers = #tpu.dot_dimension_numbers<[1], [0], [0], [1], [0, 0, 1, 1], [], []>} : vector<16x32xbf16>, vector<32x64xbf16>, vector<16x64xf32> -> vector<16x64xf32>
    %c0_45 = arith.constant 0 : index
    %c0_46 = arith.constant 0 : index
    %125 = vector.load %arg7[%c0_45, %c0_46] : memref<1x64xf32, #tpu.memory_space<vmem>>, vector<1x64xf32>
    %126 = vector.broadcast %125 : vector<1x64xf32> to vector<16x64xf32>
    %127 = arith.addf %124, %126 : vector<16x64xf32>
    %cst_47 = arith.constant 0.000000e+00 : f32
    %128 = vector.broadcast %cst_47 : f32 to vector<16x64xf32>
    %129 = arith.maximumf %127, %128 : vector<16x64xf32>
    %130 = arith.truncf %129 : vector<16x64xf32> to vector<16x64xbf16>
    %c0_48 = arith.constant 0 : index
    %c0_49 = arith.constant 0 : index
    %131 = vector.load %arg8[%c0_48, %c0_49] : memref<64x32xbf16, #tpu.memory_space<vmem>>, vector<64x32xbf16>
    %cst_50 = arith.constant dense<0.000000e+00> : vector<16x32xf32>
    %132 = tpu.matmul %130, %131, %cst_50 {dimension_numbers = #tpu.dot_dimension_numbers<[1], [0], [0], [1], [0, 0, 1, 1], [], []>} : vector<16x64xbf16>, vector<64x32xbf16>, vector<16x32xf32> -> vector<16x32xf32>
    %c0_51 = arith.constant 0 : index
    %c0_52 = arith.constant 0 : index
    %133 = vector.load %arg9[%c0_51, %c0_52] : memref<1x32xf32, #tpu.memory_space<vmem>>, vector<1x32xf32>
    %134 = vector.broadcast %133 : vector<1x32xf32> to vector<16x32xf32>
    %135 = arith.addf %132, %134 : vector<16x32xf32>
    %136 = arith.addf %97, %135 : vector<16x32xf32>
    %cst_53 = arith.constant dense<0.000000e+00> : vector<16xf32>
    %137 = vector.multi_reduction <add>, %136, %cst_53 [1] : vector<16x32xf32> to vector<16xf32>
    %138 = vector.shape_cast %137 : vector<16xf32> to vector<16x1xf32>
    %cst_54 = arith.constant 3.200000e+01 : f32
    %139 = vector.broadcast %cst_54 : f32 to vector<16x1xf32>
    %140 = arith.divf %138, %139 : vector<16x1xf32>
    %141 = vector.broadcast %140 : vector<16x1xf32> to vector<16x32xf32>
    %142 = arith.subf %136, %141 : vector<16x32xf32>
    %143 = arith.mulf %142, %142 : vector<16x32xf32>
    %cst_55 = arith.constant dense<0.000000e+00> : vector<16xf32>
    %144 = vector.multi_reduction <add>, %143, %cst_55 [1] : vector<16x32xf32> to vector<16xf32>
    %145 = vector.shape_cast %144 : vector<16xf32> to vector<16x1xf32>
    %cst_56 = arith.constant 3.200000e+01 : f32
    %146 = vector.broadcast %cst_56 : f32 to vector<16x1xf32>
    %147 = arith.divf %145, %146 : vector<16x1xf32>
    %148 = vector.broadcast %140 : vector<16x1xf32> to vector<16x32xf32>
    %149 = arith.subf %136, %148 : vector<16x32xf32>
    %cst_57 = arith.constant 9.99999974E-6 : f32
    %150 = vector.broadcast %cst_57 : f32 to vector<16x1xf32>
    %151 = arith.addf %147, %150 : vector<16x1xf32>
    %152 = math.rsqrt %151 : vector<16x1xf32>
    %153 = vector.broadcast %152 : vector<16x1xf32> to vector<16x32xf32>
    %154 = arith.mulf %149, %153 : vector<16x32xf32>
    %c0_58 = arith.constant 0 : index
    %c0_59 = arith.constant 0 : index
    %155 = vector.load %arg12[%c0_58, %c0_59] : memref<1x32xf32, #tpu.memory_space<vmem>>, vector<1x32xf32>
    %156 = vector.broadcast %155 : vector<1x32xf32> to vector<16x32xf32>
    %157 = arith.mulf %154, %156 : vector<16x32xf32>
    %c0_60 = arith.constant 0 : index
    %c0_61 = arith.constant 0 : index
    %158 = vector.load %arg13[%c0_60, %c0_61] : memref<1x32xf32, #tpu.memory_space<vmem>>, vector<1x32xf32>
    %159 = vector.broadcast %158 : vector<1x32xf32> to vector<16x32xf32>
    %160 = arith.addf %157, %159 : vector<16x32xf32>
    %c0_62 = arith.constant 0 : index
    %c0_63 = arith.constant 0 : index
    %161 = vector.load %arg14[%c0_62, %c0_63] : memref<16x32xf32, #tpu.memory_space<vmem>>, vector<16x32xf32>
    tpu.vector_store %arg14[%c0_62, %c0_63], %160 {strides = array<i32>} : memref<16x32xf32, #tpu.memory_space<vmem>>, vector<16x32xf32>,
    return
  }
  func.func @transform_0(%arg0: i32) -> (i32, i32) {
    %c0_i32 = arith.constant 0 : i32
    %c0_i32_0 = arith.constant 0 : i32
    return %arg0, %c0_i32 : i32, i32
  }
  func.func @transform_1(%arg0: i32) -> (i32, i32) {
    %c0_i32 = arith.constant 0 : i32
    %c0_i32_0 = arith.constant 0 : i32
    %c0_i32_1 = arith.constant 0 : i32
    return %c0_i32, %c0_i32_0 : i32, i32
  }
  func.func @transform_2(%arg0: i32) -> (i32, i32) {
    %c0_i32 = arith.constant 0 : i32
    %c0_i32_0 = arith.constant 0 : i32
    %c0_i32_1 = arith.constant 0 : i32
    return %c0_i32, %c0_i32_0 : i32, i32
  }
  func.func @transform_3(%arg0: i32) -> (i32, i32) {
    %c0_i32 = arith.constant 0 : i32
    %c0_i32_0 = arith.constant 0 : i32
    %c0_i32_1 = arith.constant 0 : i32
    return %c0_i32, %c0_i32_0 : i32, i32
  }
  func.func @transform_4(%arg0: i32) -> (i32, i32) {
    %c0_i32 = arith.constant 0 : i32
    %c0_i32_0 = arith.constant 0 : i32
    %c0_i32_1 = arith.constant 0 : i32
    return %c0_i32, %c0_i32_0 : i32, i32
  }
  func.func @transform_5(%arg0: i32) -> (i32, i32) {
    %c0_i32 = arith.constant 0 : i32
    %c0_i32_0 = arith.constant 0 : i32
    %c0_i32_1 = arith.constant 0 : i32
    return %c0_i32, %c0_i32_0 : i32, i32
  }
  func.func @transform_6(%arg0: i32) -> (i32, i32) {
    %c0_i32 = arith.constant 0 : i32
    %c0_i32_0 = arith.constant 0 : i32
    %c0_i32_1 = arith.constant 0 : i32
    return %c0_i32, %c0_i32_0 : i32, i32
  }
  func.func @transform_7(%arg0: i32) -> (i32, i32) {
    %c0_i32 = arith.constant 0 : i32
    %c0_i32_0 = arith.constant 0 : i32
    %c0_i32_1 = arith.constant 0 : i32
    return %c0_i32, %c0_i32_0 : i32, i32
  }
  func.func @transform_8(%arg0: i32) -> (i32, i32) {
    %c0_i32 = arith.constant 0 : i32
    %c0_i32_0 = arith.constant 0 : i32
    %c0_i32_1 = arith.constant 0 : i32
    return %c0_i32, %c0_i32_0 : i32, i32
  }
  func.func @transform_9(%arg0: i32) -> (i32, i32) {
    %c0_i32 = arith.constant 0 : i32
    %c0_i32_0 = arith.constant 0 : i32
    %c0_i32_1 = arith.constant 0 : i32
    return %c0_i32, %c0_i32_0 : i32, i32
  }
  func.func @transform_10(%arg0: i32) -> (i32, i32) {
    %c0_i32 = arith.constant 0 : i32
    %c0_i32_0 = arith.constant 0 : i32
    %c0_i32_1 = arith.constant 0 : i32
    return %c0_i32, %c0_i32_0 : i32, i32
  }
  func.func @transform_11(%arg0: i32) -> (i32, i32) {
    %c0_i32 = arith.constant 0 : i32
    %c0_i32_0 = arith.constant 0 : i32
    %c0_i32_1 = arith.constant 0 : i32
    return %c0_i32, %c0_i32_0 : i32, i32
  }
  func.func @transform_12(%arg0: i32) -> (i32, i32) {
    %c0_i32 = arith.constant 0 : i32
    %c0_i32_0 = arith.constant 0 : i32
    %c0_i32_1 = arith.constant 0 : i32
    return %c0_i32, %c0_i32_0 : i32, i32
  }
  func.func @transform_13(%arg0: i32) -> (i32, i32) {
    %c0_i32 = arith.constant 0 : i32
    %c0_i32_0 = arith.constant 0 : i32
    return %arg0, %c0_i32 : i32, i32
  }
}

module attributes {stable_mosaic.version = 11 : i64} {
  func.func @encoder_layer_kernel(%arg0: i32, %arg1: memref<16x32xf32, #tpu.memory_space<vmem>>, %arg2: memref<32x96xbf16, #tpu.memory_space<vmem>>, %arg3: memref<1x96xf32, #tpu.memory_space<vmem>>, %arg4: memref<32x32xbf16, #tpu.memory_space<vmem>>, %arg5: memref<1x32xf32, #tpu.memory_space<vmem>>, %arg6: memref<32x64xbf16, #tpu.memory_space<vmem>>, %arg7: memref<1x64xf32, #tpu.memory_space<vmem>>, %arg8: memref<64x32xbf16, #tpu.memory_space<vmem>>, %arg9: memref<1x32xf32, #tpu.memory_space<vmem>>, %arg10: memref<1x32xf32, #tpu.memory_space<vmem>>, %arg11: memref<1x32xf32, #tpu.memory_space<vmem>>, %arg12: memref<1x32xf32, #tpu.memory_space<vmem>>, %arg13: memref<1x32xf32, #tpu.memory_space<vmem>>, %arg14: memref<16x32xf32, #tpu.memory_space<vmem>>) attributes {dimension_semantics = [#tpu.dimension_semantics<parallel>], iteration_bounds = array<i64: 1>, scalar_prefetch = 0 : i64, scratch_operands = 0 : i64, tpu.core_type = #tpu.core_type<tc>, window_params = [{transform_indices = @transform_0, window_bounds = array<i64: 16, 32>}, {pipeline_mode = #tpu.pipeline_mode<synchronous>, transform_indices = @transform_1, window_bounds = array<i64: 32, 96>}, {pipeline_mode = #tpu.pipeline_mode<synchronous>, transform_indices = @transform_2, window_bounds = array<i64: 1, 96>}, {pipeline_mode = #tpu.pipeline_mode<synchronous>, transform_indices = @transform_3, window_bounds = array<i64: 32, 32>}, {pipeline_mode = #tpu.pipeline_mode<synchronous>, transform_indices = @transform_4, window_bounds = array<i64: 1, 32>}, {pipeline_mode = #tpu.pipeline_mode<synchronous>, transform_indices = @transform_5, window_bounds = array<i64: 32, 64>}, {pipeline_mode = #tpu.pipeline_mode<synchronous>, transform_indices = @transform_6, window_bounds = array<i64: 1, 64>}, {pipeline_mode = #tpu.pipeline_mode<synchronous>, transform_indices = @transform_7, window_bounds = array<i64: 64, 32>}, {pipeline_mode = #tpu.pipeline_mode<synchronous>, transform_indices = @transform_8, window_bounds = array<i64: 1, 32>}, {pipeline_mode = #tpu.pipeline_mode<synchronous>, transform_indices = @transform_9, window_bounds = array<i64: 1, 32>}, {pipeline_mode = #tpu.pipeline_mode<synchronous>, transform_indices = @transform_10, window_bounds = array<i64: 1, 32>}, {pipeline_mode = #tpu.pipeline_mode<synchronous>, transform_indices = @transform_11, window_bounds = array<i64: 1, 32>}, {pipeline_mode = #tpu.pipeline_mode<synchronous>, transform_indices = @transform_12, window_bounds = array<i64: 1, 32>}, {transform_indices = @transform_13, window_bounds = array<i64: 16, 32>}]} {
    %c0 = arith.constant 0 : index
    %c0_0 = arith.constant 0 : index
    %0 = vector.load %arg1[%c0, %c0_0] : memref<16x32xf32, #tpu.memory_space<vmem>>, vector<16x32xf32>
    %1 = arith.truncf %0 : vector<16x32xf32> to vector<16x32xbf16>
    %c0_1 = arith.constant 0 : index
    %c0_2 = arith.constant 0 : index
    %2 = vector.load %arg2[%c0_1, %c0_2] : memref<32x96xbf16, #tpu.memory_space<vmem>>, vector<32x96xbf16>
    %cst = arith.constant dense<0.000000e+00> : vector<16x96xf32>
    %3 = tpu.matmul %1, %2, %cst {dimension_numbers = #tpu.dot_dimension_numbers<[1], [0], [0], [1], [0, 0, 1, 1], [], []>} : vector<16x32xbf16>, vector<32x96xbf16>, vector<16x96xf32> -> vector<16x96xf32>
    %c0_3 = arith.constant 0 : index
    %c0_4 = arith.constant 0 : index
    %4 = vector.load %arg3[%c0_3, %c0_4] : memref<1x96xf32, #tpu.memory_space<vmem>>, vector<1x96xf32>
    %5 = vector.broadcast %4 : vector<1x96xf32> to vector<16x96xf32>
    %6 = arith.addf %3, %5 : vector<16x96xf32>
    %7 = arith.truncf %6 : vector<16x96xf32> to vector<16x96xbf16>
    %8 = vector.shape_cast %7 : vector<16x96xbf16> to vector<2x8x96xbf16>
    %cst_5 = arith.constant 0.000000e+00 : f32
    %9 = vector.broadcast %cst_5 : f32 to vector<16x32xf32>
    %10 = vector.extract_strided_slice %8 {offsets = [0, 0, 0], sizes = [2, 8, 8], strides = [1, 1, 1]} : vector<2x8x96xbf16> to vector<2x8x8xbf16>
    %11 = vector.extract_strided_slice %8 {offsets = [0, 0, 32], sizes = [2, 8, 8], strides = [1, 1, 1]} : vector<2x8x96xbf16> to vector<2x8x8xbf16>
    %12 = vector.extract_strided_slice %8 {offsets = [0, 0, 64], sizes = [2, 8, 8], strides = [1, 1, 1]} : vector<2x8x96xbf16> to vector<2x8x8xbf16>
    "tpu.trace_start"() <{level = 10 : i32, message = "bqd,bkd->bqk"}> : () -> ()
    %cst_6 = arith.constant dense<0.000000e+00> : vector<2x8x8xf32>
    %13 = tpu.matmul %10, %11, %cst_6 {dimension_numbers = #tpu.dot_dimension_numbers<[2], [2], [1], [1], [0, 0, 0, 1, 1, 1], [0], [0]>} : vector<2x8x8xbf16>, vector<2x8x8xbf16>, vector<2x8x8xf32> -> vector<2x8x8xf32>
    "tpu.trace_stop"() : () -> ()
    %cst_7 = arith.constant dense<0xFF800000> : vector<2x8xf32>
    %14 = vector.multi_reduction <maximumf>, %13, %cst_7 [2] : vector<2x8x8xf32> to vector<2x8xf32>
    %15 = vector.shape_cast %14 : vector<2x8xf32> to vector<2x8x1xf32>
    %16 = vector.broadcast %15 : vector<2x8x1xf32> to vector<2x8x8xf32>
    %17 = arith.subf %13, %16 : vector<2x8x8xf32>
    %18 = math.exp %17 : vector<2x8x8xf32>
    %cst_8 = arith.constant dense<0.000000e+00> : vector<2x8xf32>
    %19 = vector.multi_reduction <add>, %18, %cst_8 [2] : vector<2x8x8xf32> to vector<2x8xf32>
    %20 = vector.shape_cast %19 : vector<2x8xf32> to vector<2x8x1xf32>
    %21 = arith.truncf %18 : vector<2x8x8xf32> to vector<2x8x8xbf16>
    "tpu.trace_start"() <{level = 10 : i32, message = "bqk,bkd->bqd"}> : () -> ()
    %cst_9 = arith.constant dense<0.000000e+00> : vector<2x8x8xf32>
    %22 = tpu.matmul %21, %12, %cst_9 {dimension_numbers = #tpu.dot_dimension_numbers<[2], [1], [1], [2], [0, 0, 0, 1, 1, 2], [0], [0]>} : vector<2x8x8xbf16>, vector<2x8x8xbf16>, vector<2x8x8xf32> -> vector<2x8x8xf32>
    "tpu.trace_stop"() : () -> ()
    %23 = tpu.reciprocal %20 {approx = true} : vector<2x8x1xf32> -> vector<2x8x1xf32>
    %24 = vector.broadcast %23 : vector<2x8x1xf32> to vector<2x8x8xf32>
    %25 = arith.mulf %22, %24 : vector<2x8x8xf32>
    %26 = vector.shape_cast %25 : vector<2x8x8xf32> to vector<16x8xf32>
    %27 = arith.truncf %26 : vector<16x8xf32> to vector<16x8xbf16>
    %c0_10 = arith.constant 0 : index
    %c0_11 = arith.constant 0 : index
    %28 = vector.load %arg4[%c0_10, %c0_11] : memref<32x32xbf16, #tpu.memory_space<vmem>>, vector<8x32xbf16>
    %cst_12 = arith.constant dense<0.000000e+00> : vector<16x32xf32>
    %29 = tpu.matmul %27, %28, %cst_12 {dimension_numbers = #tpu.dot_dimension_numbers<[1], [0], [0], [1], [0, 0, 1, 1], [], []>} : vector<16x8xbf16>, vector<8x32xbf16>, vector<16x32xf32> -> vector<16x32xf32>
    %30 = arith.addf %9, %29 : vector<16x32xf32>
    %31 = vector.extract_strided_slice %8 {offsets = [0, 0, 8], sizes = [2, 8, 8], strides = [1, 1, 1]} : vector<2x8x96xbf16> to vector<2x8x8xbf16>
    %32 = vector.extract_strided_slice %8 {offsets = [0, 0, 40], sizes = [2, 8, 8], strides = [1, 1, 1]} : vector<2x8x96xbf16> to vector<2x8x8xbf16>
    %33 = vector.extract_strided_slice %8 {offsets = [0, 0, 72], sizes = [2, 8, 8], strides = [1, 1, 1]} : vector<2x8x96xbf16> to vector<2x8x8xbf16>
    "tpu.trace_start"() <{level = 10 : i32, message = "bqd,bkd->bqk"}> : () -> ()
    %cst_13 = arith.constant dense<0.000000e+00> : vector<2x8x8xf32>
    %34 = tpu.matmul %31, %32, %cst_13 {dimension_numbers = #tpu.dot_dimension_numbers<[2], [2], [1], [1], [0, 0, 0, 1, 1, 1], [0], [0]>} : vector<2x8x8xbf16>, vector<2x8x8xbf16>, vector<2x8x8xf32> -> vector<2x8x8xf32>
    "tpu.trace_stop"() : () -> ()
    %cst_14 = arith.constant dense<0xFF800000> : vector<2x8xf32>
    %35 = vector.multi_reduction <maximumf>, %34, %cst_14 [2] : vector<2x8x8xf32> to vector<2x8xf32>
    %36 = vector.shape_cast %35 : vector<2x8xf32> to vector<2x8x1xf32>
    %37 = vector.broadcast %36 : vector<2x8x1xf32> to vector<2x8x8xf32>
    %38 = arith.subf %34, %37 : vector<2x8x8xf32>
    %39 = math.exp %38 : vector<2x8x8xf32>
    %cst_15 = arith.constant dense<0.000000e+00> : vector<2x8xf32>
    %40 = vector.multi_reduction <add>, %39, %cst_15 [2] : vector<2x8x8xf32> to vector<2x8xf32>
    %41 = vector.shape_cast %40 : vector<2x8xf32> to vector<2x8x1xf32>
    %42 = arith.truncf %39 : vector<2x8x8xf32> to vector<2x8x8xbf16>
    "tpu.trace_start"() <{level = 10 : i32, message = "bqk,bkd->bqd"}> : () -> ()
    %cst_16 = arith.constant dense<0.000000e+00> : vector<2x8x8xf32>
    %43 = tpu.matmul %42, %33, %cst_16 {dimension_numbers = #tpu.dot_dimension_numbers<[2], [1], [1], [2], [0, 0, 0, 1, 1, 2], [0], [0]>} : vector<2x8x8xbf16>, vector<2x8x8xbf16>, vector<2x8x8xf32> -> vector<2x8x8xf32>
    "tpu.trace_stop"() : () -> ()
    %44 = tpu.reciprocal %41 {approx = true} : vector<2x8x1xf32> -> vector<2x8x1xf32>
    %45 = vector.broadcast %44 : vector<2x8x1xf32> to vector<2x8x8xf32>
    %46 = arith.mulf %43, %45 : vector<2x8x8xf32>
    %47 = vector.shape_cast %46 : vector<2x8x8xf32> to vector<16x8xf32>
    %48 = arith.truncf %47 : vector<16x8xf32> to vector<16x8xbf16>
    %c8 = arith.constant 8 : index
    %c0_17 = arith.constant 0 : index
    %49 = vector.load %arg4[%c8, %c0_17] : memref<32x32xbf16, #tpu.memory_space<vmem>>, vector<8x32xbf16>
    %cst_18 = arith.constant dense<0.000000e+00> : vector<16x32xf32>
    %50 = tpu.matmul %48, %49, %cst_18 {dimension_numbers = #tpu.dot_dimension_numbers<[1], [0], [0], [1], [0, 0, 1, 1], [], []>} : vector<16x8xbf16>, vector<8x32xbf16>, vector<16x32xf32> -> vector<16x32xf32>
    %51 = arith.addf %30, %50 : vector<16x32xf32>
    %52 = vector.extract_strided_slice %8 {offsets = [0, 0, 16], sizes = [2, 8, 8], strides = [1, 1, 1]} : vector<2x8x96xbf16> to vector<2x8x8xbf16>
    %53 = vector.extract_strided_slice %8 {offsets = [0, 0, 48], sizes = [2, 8, 8], strides = [1, 1, 1]} : vector<2x8x96xbf16> to vector<2x8x8xbf16>
    %54 = vector.extract_strided_slice %8 {offsets = [0, 0, 80], sizes = [2, 8, 8], strides = [1, 1, 1]} : vector<2x8x96xbf16> to vector<2x8x8xbf16>
    "tpu.trace_start"() <{level = 10 : i32, message = "bqd,bkd->bqk"}> : () -> ()
    %cst_19 = arith.constant dense<0.000000e+00> : vector<2x8x8xf32>
    %55 = tpu.matmul %52, %53, %cst_19 {dimension_numbers = #tpu.dot_dimension_numbers<[2], [2], [1], [1], [0, 0, 0, 1, 1, 1], [0], [0]>} : vector<2x8x8xbf16>, vector<2x8x8xbf16>, vector<2x8x8xf32> -> vector<2x8x8xf32>
    "tpu.trace_stop"() : () -> ()
    %cst_20 = arith.constant dense<0xFF800000> : vector<2x8xf32>
    %56 = vector.multi_reduction <maximumf>, %55, %cst_20 [2] : vector<2x8x8xf32> to vector<2x8xf32>
    %57 = vector.shape_cast %56 : vector<2x8xf32> to vector<2x8x1xf32>
    %58 = vector.broadcast %57 : vector<2x8x1xf32> to vector<2x8x8xf32>
    %59 = arith.subf %55, %58 : vector<2x8x8xf32>
    %60 = math.exp %59 : vector<2x8x8xf32>
    %cst_21 = arith.constant dense<0.000000e+00> : vector<2x8xf32>
    %61 = vector.multi_reduction <add>, %60, %cst_21 [2] : vector<2x8x8xf32> to vector<2x8xf32>
    %62 = vector.shape_cast %61 : vector<2x8xf32> to vector<2x8x1xf32>
    %63 = arith.truncf %60 : vector<2x8x8xf32> to vector<2x8x8xbf16>
    "tpu.trace_start"() <{level = 10 : i32, message = "bqk,bkd->bqd"}> : () -> ()
    %cst_22 = arith.constant dense<0.000000e+00> : vector<2x8x8xf32>
    %64 = tpu.matmul %63, %54, %cst_22 {dimension_numbers = #tpu.dot_dimension_numbers<[2], [1], [1], [2], [0, 0, 0, 1, 1, 2], [0], [0]>} : vector<2x8x8xbf16>, vector<2x8x8xbf16>, vector<2x8x8xf32> -> vector<2x8x8xf32>
    "tpu.trace_stop"() : () -> ()
    %65 = tpu.reciprocal %62 {approx = true} : vector<2x8x1xf32> -> vector<2x8x1xf32>
    %66 = vector.broadcast %65 : vector<2x8x1xf32> to vector<2x8x8xf32>
    %67 = arith.mulf %64, %66 : vector<2x8x8xf32>
    %68 = vector.shape_cast %67 : vector<2x8x8xf32> to vector<16x8xf32>
    %69 = arith.truncf %68 : vector<16x8xf32> to vector<16x8xbf16>
    %c16 = arith.constant 16 : index
    %c0_23 = arith.constant 0 : index
    %70 = vector.load %arg4[%c16, %c0_23] : memref<32x32xbf16, #tpu.memory_space<vmem>>, vector<8x32xbf16>
    %cst_24 = arith.constant dense<0.000000e+00> : vector<16x32xf32>
    %71 = tpu.matmul %69, %70, %cst_24 {dimension_numbers = #tpu.dot_dimension_numbers<[1], [0], [0], [1], [0, 0, 1, 1], [], []>} : vector<16x8xbf16>, vector<8x32xbf16>, vector<16x32xf32> -> vector<16x32xf32>
    %72 = arith.addf %51, %71 : vector<16x32xf32>
    %73 = vector.extract_strided_slice %8 {offsets = [0, 0, 24], sizes = [2, 8, 8], strides = [1, 1, 1]} : vector<2x8x96xbf16> to vector<2x8x8xbf16>
    %74 = vector.extract_strided_slice %8 {offsets = [0, 0, 56], sizes = [2, 8, 8], strides = [1, 1, 1]} : vector<2x8x96xbf16> to vector<2x8x8xbf16>
    %75 = vector.extract_strided_slice %8 {offsets = [0, 0, 88], sizes = [2, 8, 8], strides = [1, 1, 1]} : vector<2x8x96xbf16> to vector<2x8x8xbf16>
    "tpu.trace_start"() <{level = 10 : i32, message = "bqd,bkd->bqk"}> : () -> ()
    %cst_25 = arith.constant dense<0.000000e+00> : vector<2x8x8xf32>
    %76 = tpu.matmul %73, %74, %cst_25 {dimension_numbers = #tpu.dot_dimension_numbers<[2], [2], [1], [1], [0, 0, 0, 1, 1, 1], [0], [0]>} : vector<2x8x8xbf16>, vector<2x8x8xbf16>, vector<2x8x8xf32> -> vector<2x8x8xf32>
    "tpu.trace_stop"() : () -> ()
    %cst_26 = arith.constant dense<0xFF800000> : vector<2x8xf32>
    %77 = vector.multi_reduction <maximumf>, %76, %cst_26 [2] : vector<2x8x8xf32> to vector<2x8xf32>
    %78 = vector.shape_cast %77 : vector<2x8xf32> to vector<2x8x1xf32>
    %79 = vector.broadcast %78 : vector<2x8x1xf32> to vector<2x8x8xf32>
    %80 = arith.subf %76, %79 : vector<2x8x8xf32>
    %81 = math.exp %80 : vector<2x8x8xf32>
    %cst_27 = arith.constant dense<0.000000e+00> : vector<2x8xf32>
    %82 = vector.multi_reduction <add>, %81, %cst_27 [2] : vector<2x8x8xf32> to vector<2x8xf32>
    %83 = vector.shape_cast %82 : vector<2x8xf32> to vector<2x8x1xf32>
    %84 = arith.truncf %81 : vector<2x8x8xf32> to vector<2x8x8xbf16>
    "tpu.trace_start"() <{level = 10 : i32, message = "bqk,bkd->bqd"}> : () -> ()
    %cst_28 = arith.constant dense<0.000000e+00> : vector<2x8x8xf32>
    %85 = tpu.matmul %84, %75, %cst_28 {dimension_numbers = #tpu.dot_dimension_numbers<[2], [1], [1], [2], [0, 0, 0, 1, 1, 2], [0], [0]>} : vector<2x8x8xbf16>, vector<2x8x8xbf16>, vector<2x8x8xf32> -> vector<2x8x8xf32>
    "tpu.trace_stop"() : () -> ()
    %86 = tpu.reciprocal %83 {approx = true} : vector<2x8x1xf32> -> vector<2x8x1xf32>
    %87 = vector.broadcast %86 : vector<2x8x1xf32> to vector<2x8x8xf32>
    %88 = arith.mulf %85, %87 : vector<2x8x8xf32>
    %89 = vector.shape_cast %88 : vector<2x8x8xf32> to vector<16x8xf32>
    %90 = arith.truncf %89 : vector<16x8xf32> to vector<16x8xbf16>
    %c24 = arith.constant 24 : index
    %c0_29 = arith.constant 0 : index
    %91 = vector.load %arg4[%c24, %c0_29] : memref<32x32xbf16, #tpu.memory_space<vmem>>, vector<8x32xbf16>
    %cst_30 = arith.constant dense<0.000000e+00> : vector<16x32xf32>
    %92 = tpu.matmul %90, %91, %cst_30 {dimension_numbers = #tpu.dot_dimension_numbers<[1], [0], [0], [1], [0, 0, 1, 1], [], []>} : vector<16x8xbf16>, vector<8x32xbf16>, vector<16x32xf32> -> vector<16x32xf32>
    %93 = arith.addf %72, %92 : vector<16x32xf32>
    %c0_31 = arith.constant 0 : index
    %c0_32 = arith.constant 0 : index
    %94 = vector.load %arg5[%c0_31, %c0_32] : memref<1x32xf32, #tpu.memory_space<vmem>>, vector<1x32xf32>
    %95 = vector.broadcast %94 : vector<1x32xf32> to vector<16x32xf32>
    %96 = arith.addf %93, %95 : vector<16x32xf32>
    %97 = arith.addf %0, %96 : vector<16x32xf32>
    %cst_33 = arith.constant dense<0.000000e+00> : vector<16xf32>
    %98 = vector.multi_reduction <add>, %97, %cst_33 [1] : vector<16x32xf32> to vector<16xf32>
    %99 = vector.shape_cast %98 : vector<16xf32> to vector<16x1xf32>
    %cst_34 = arith.constant 3.200000e+01 : f32
    %100 = vector.broadcast %cst_34 : f32 to vector<16x1xf32>
    %101 = arith.divf %99, %100 : vector<16x1xf32>
    %102 = vector.broadcast %101 : vector<16x1xf32> to vector<16x32xf32>
    %103 = arith.subf %97, %102 : vector<16x32xf32>
    %104 = arith.mulf %103, %103 : vector<16x32xf32>
    %cst_35 = arith.constant dense<0.000000e+00> : vector<16xf32>
    %105 = vector.multi_reduction <add>, %104, %cst_35 [1] : vector<16x32xf32> to vector<16xf32>
    %106 = vector.shape_cast %105 : vector<16xf32> to vector<16x1xf32>
    %cst_36 = arith.constant 3.200000e+01 : f32
    %107 = vector.broadcast %cst_36 : f32 to vector<16x1xf32>
    %108 = arith.divf %106, %107 : vector<16x1xf32>
    %109 = vector.broadcast %101 : vector<16x1xf32> to vector<16x32xf32>
    %110 = arith.subf %97, %109 : vector<16x32xf32>
    %cst_37 = arith.constant 9.99999974E-6 : f32
    %111 = vector.broadcast %cst_37 : f32 to vector<16x1xf32>
    %112 = arith.addf %108, %111 : vector<16x1xf32>
    %113 = math.rsqrt %112 : vector<16x1xf32>
    %114 = vector.broadcast %113 : vector<16x1xf32> to vector<16x32xf32>
    %115 = arith.mulf %110, %114 : vector<16x32xf32>
    %c0_38 = arith.constant 0 : index
    %c0_39 = arith.constant 0 : index
    %116 = vector.load %arg10[%c0_38, %c0_39] : memref<1x32xf32, #tpu.memory_space<vmem>>, vector<1x32xf32>
    %117 = vector.broadcast %116 : vector<1x32xf32> to vector<16x32xf32>
    %118 = arith.mulf %115, %117 : vector<16x32xf32>
    %c0_40 = arith.constant 0 : index
    %c0_41 = arith.constant 0 : index
    %119 = vector.load %arg11[%c0_40, %c0_41] : memref<1x32xf32, #tpu.memory_space<vmem>>, vector<1x32xf32>
    %120 = vector.broadcast %119 : vector<1x32xf32> to vector<16x32xf32>
    %121 = arith.addf %118, %120 : vector<16x32xf32>
    %122 = arith.truncf %121 : vector<16x32xf32> to vector<16x32xbf16>
    %c0_42 = arith.constant 0 : index
    %c0_43 = arith.constant 0 : index
    %123 = vector.load %arg6[%c0_42, %c0_43] : memref<32x64xbf16, #tpu.memory_space<vmem>>, vector<32x64xbf16>
    %cst_44 = arith.constant dense<0.000000e+00> : vector<16x64xf32>
    %124 = tpu.matmul %122, %123, %cst_44 {dimension_numbers = #tpu.dot_dimension_numbers<[1], [0], [0], [1], [0, 0, 1, 1], [], []>} : vector<16x32xbf16>, vector<32x64xbf16>, vector<16x64xf32> -> vector<16x64xf32>
    %c0_45 = arith.constant 0 : index
    %c0_46 = arith.constant 0 : index
    %125 = vector.load %arg7[%c0_45, %c0_46] : memref<1x64xf32, #tpu.memory_space<vmem>>, vector<1x64xf32>
    %126 = vector.broadcast %125 : vector<1x64xf32> to vector<16x64xf32>
    %127 = arith.addf %124, %126 : vector<16x64xf32>
    %cst_47 = arith.constant 0.000000e+00 : f32
    %128 = vector.broadcast %cst_47 : f32 to vector<16x64xf32>
    %129 = arith.maximumf %127, %128 : vector<16x64xf32>
    %130 = arith.truncf %129 : vector<16x64xf32> to vector<16x64xbf16>
    %c0_48 = arith.constant 0 : index
    %c0_49 = arith.constant 0 : index
    %131 = vector.load %arg8[%c0_48, %c0_49] : memref<64x32xbf16, #tpu.memory_space<vmem>>, vector<64x32xbf16>
    %cst_50 = arith.constant dense<0.000000e+00> : vector<16x32xf32>
    %132 = tpu.matmul %130, %131, %cst_50 {dimension_numbers = #tpu.dot_dimension_numbers<[1], [0], [0], [1], [0, 0, 1, 1], [], []>} : vector<16x64xbf16>, vector<64x32xbf16>, vector<16x32xf32> -> vector<16x32xf32>
    %c0_51 = arith.constant 0 : index
    %c0_52 = arith.constant 0 : index
    %133 = vector.load %arg9[%c0_51, %c0_52] : memref<1x32xf32, #tpu.memory_space<vmem>>, vector<1x32xf32>
    %134 = vector.broadcast %133 : vector<1x32xf32> to vector<16x32xf32>
    %135 = arith.addf %132, %134 : vector<16x32xf32>
    %136 = arith.addf %97, %135 : vector<16x32xf32>
    %cst_53 = arith.constant dense<0.000000e+00> : vector<16xf32>
    %137 = vector.multi_reduction <add>, %136, %cst_53 [1] : vector<16x32xf32> to vector<16xf32>
    %138 = vector.shape_cast %137 : vector<16xf32> to vector<16x1xf32>
    %cst_54 = arith.constant 3.200000e+01 : f32
    %139 = vector.broadcast %cst_54 : f32 to vector<16x1xf32>
    %140 = arith.divf %138, %139 : vector<16x1xf32>
    %141 = vector.broadcast %140 : vector<16x1xf32> to vector<16x32xf32>
    %142 = arith.subf %136, %141 : vector<16x32xf32>
    %143 = arith.mulf %142, %142 : vector<16x32xf32>
    %cst_55 = arith.constant dense<0.000000e+00> : vector<16xf32>
    %144 = vector.multi_reduction <add>, %143, %cst_55 [1] : vector<16x32xf32> to vector<16xf32>
    %145 = vector.shape_cast %144 : vector<16xf32> to vector<16x1xf32>
    %cst_56 = arith.constant 3.200000e+01 : f32
    %146 = vector.broadcast %cst_56 : f32 to vector<16x1xf32>
    %147 = arith.divf %145, %146 : vector<16x1xf32>
    %148 = vector.broadcast %140 : vector<16x1xf32> to vector<16x32xf32>
    %149 = arith.subf %136, %148 : vector<16x32xf32>
    %cst_57 = arith.constant 9.99999974E-6 : f32
    %150 = vector.broadcast %cst_57 : f32 to vector<16x1xf32>
    %151 = arith.addf %147, %150 : vector<16x1xf32>
    %152 = math.rsqrt %151 : vector<16x1xf32>
    %153 = vector.broadcast %152 : vector<16x1xf32> to vector<16x32xf32>
    %154 = arith.mulf %149, %153 : vector<16x32xf32>
    %c0_58 = arith.constant 0 : index
    %c0_59 = arith.constant 0 : index
    %155 = vector.load %arg12[%c0_58, %c0_59] : memref<1x32xf32, #tpu.memory_space<vmem>>, vector<1x32xf32>
    %156 = vector.broadcast %155 : vector<1x32xf32> to vector<16x32xf32>
    %157 = arith.mulf %154, %156 : vector<16x32xf32>
    %c0_60 = arith.constant 0 : index
    %c0_61 = arith.constant 0 : index
    %158 = vector.load %arg13[%c0_60, %c0_61] : memref<1x32xf32, #tpu.memory_space<vmem>>, vector<1x32xf32>
    %159 = vector.broadcast %158 : vector<1x32xf32> to vector<16x32xf32>
    %160 = arith.addf %157, %159 : vector<16x32xf32>
    %c0_62 = arith.constant 0 : index
    %c0_63 = arith.constant 0 : index
    %161 = vector.load %arg14[%c0_62, %c0_63] : memref<16x32xf32, #tpu.memory_space<vmem>>, vector<16x32xf32>
    tpu.vector_store %arg14[%c0_62, %c0_63], %160 {strides = array<i32>} : memref<16x32xf32, #tpu.memory_space<vmem>>, vector<16x32xf32>,
    return
  }
  func.func @transform_0(%arg0: i32) -> (i32, i32) {
    %c0_i32 = arith.constant 0 : i32
    %c0_i32_0 = arith.constant 0 : i32
    return %arg0, %c0_i32 : i32, i32
  }
  func.func @transform_1(%arg0: i32) -> (i32, i32) {
    %c0_i32 = arith.constant 0 : i32
    %c0_i32_0 = arith.constant 0 : i32
    %c0_i32_1 = arith.constant 0 : i32
    return %c0_i32, %c0_i32_0 : i32, i32
  }
  func.func @transform_2(%arg0: i32) -> (i32, i32) {
    %c0_i32 = arith.constant 0 : i32
    %c0_i32_0 = arith.constant 0 : i32
    %c0_i32_1 = arith.constant 0 : i32
    return %c0_i32, %c0_i32_0 : i32, i32
  }
  func.func @transform_3(%arg0: i32) -> (i32, i32) {
    %c0_i32 = arith.constant 0 : i32
    %c0_i32_0 = arith.constant 0 : i32
    %c0_i32_1 = arith.constant 0 : i32
    return %c0_i32, %c0_i32_0 : i32, i32
  }
  func.func @transform_4(%arg0: i32) -> (i32, i32) {
    %c0_i32 = arith.constant 0 : i32
    %c0_i32_0 = arith.constant 0 : i32
    %c0_i32_1 = arith.constant 0 : i32
    return %c0_i32, %c0_i32_0 : i32, i32
  }
  func.func @transform_5(%arg0: i32) -> (i32, i32) {
    %c0_i32 = arith.constant 0 : i32
    %c0_i32_0 = arith.constant 0 : i32
    %c0_i32_1 = arith.constant 0 : i32
    return %c0_i32, %c0_i32_0 : i32, i32
  }
  func.func @transform_6(%arg0: i32) -> (i32, i32) {
    %c0_i32 = arith.constant 0 : i32
    %c0_i32_0 = arith.constant 0 : i32
    %c0_i32_1 = arith.constant 0 : i32
    return %c0_i32, %c0_i32_0 : i32, i32
  }
  func.func @transform_7(%arg0: i32) -> (i32, i32) {
    %c0_i32 = arith.constant 0 : i32
    %c0_i32_0 = arith.constant 0 : i32
    %c0_i32_1 = arith.constant 0 : i32
    return %c0_i32, %c0_i32_0 : i32, i32
  }
  func.func @transform_8(%arg0: i32) -> (i32, i32) {
    %c0_i32 = arith.constant 0 : i32
    %c0_i32_0 = arith.constant 0 : i32
    %c0_i32_1 = arith.constant 0 : i32
    return %c0_i32, %c0_i32_0 : i32, i32
  }
  func.func @transform_9(%arg0: i32) -> (i32, i32) {
    %c0_i32 = arith.constant 0 : i32
    %c0_i32_0 = arith.constant 0 : i32
    %c0_i32_1 = arith.constant 0 : i32
    return %c0_i32, %c0_i32_0 : i32, i32
  }
  func.func @transform_10(%arg0: i32) -> (i32, i32) {
    %c0_i32 = arith.constant 0 : i32
    %c0_i32_0 = arith.constant 0 : i32
    %c0_i32_1 = arith.constant 0 : i32
    return %c0_i32, %c0_i32_0 : i32, i32
  }
  func.func @transform_11(%arg0: i32) -> (i32, i32) {
    %c0_i32 = arith.constant 0 : i32
    %c0_i32_0 = arith.constant 0 : i32
    %c0_i32_1 = arith.constant 0 : i32
    return %c0_i32, %c0_i32_0 : i32, i32
  }
  func.func @transform_12(%arg0: i32) -> (i32, i32) {
    %c0_i32 = arith.constant 0 : i32
    %c0_i32_0 = arith.constant 0 : i32
    %c0_i32_1 = arith.constant 0 : i32
    return %c0_i32, %c0_i32_0 : i32, i32
  }
  func.func @transform_13(%arg0: i32) -> (i32, i32) {
    %c0_i32 = arith.constant 0 : i32
    %c0_i32_0 = arith.constant 0 : i32
    return %arg0, %c0_i32 : i32, i32
  }
}

</mosaic_0001>

<bundles_post_ra>
// kernel: tpu_custom_call.1
= control target key start
LH: loop header
LB: loop body
LE: loop exit
PB: predicated region body
PF: predicated region fallthrough
CT: control target
= control target key end

     0   :  { %18 = vsyncpa [#allocation3], 0  ;;  %s2229_s0 = inlined_call_operand.vmem [shape: f32[16,32], index: 0, kind: input, shape index: {}]   ;;  %s2230_s1 = inlined_call_operand.vmem [shape: bf16[32,96], index: 1, kind: input, shape index: {}]   ;;  %s2231_s2 = inlined_call_operand.vmem [shape: f32[1,96], index: 2, kind: input, shape index: {}]   ;;  %s2232_s3 = inlined_call_operand.vmem [shape: bf16[32,32], index: 3, kind: input, shape index: {}]   ;;  %s2233_s4 = inlined_call_operand.vmem [shape: f32[1,32], index: 4, kind: input, shape index: {}]   ;;  %s2234_s5 = inlined_call_operand.hbm [shape: bf16[32,64], index: 5, kind: input, shape index: {}]   ;;  %s2235_s6 = inlined_call_operand.vmem [shape: f32[1,64], index: 6, kind: input, shape index: {}]   ;;  %s2236_s7 = inlined_call_operand.vmem [shape: bf16[64,32], index: 7, kind: input, shape index: {}]   ;;  %s2237_s8 = inlined_call_operand.vmem [shape: f32[1,32], index: 8, kind: input, shape index: {}]   ;;  %s2238_s9 = inlined_call_operand.vmem [shape: f32[1,32], index: 9, kind: input, shape index: {}]   ;;  %s2239_s10 = inlined_call_operand.vmem [shape: f32[1,32], index: 10, kind: input, shape index: {}]   ;;  %s2240_s11 = inlined_call_operand.vmem [shape: f32[1,32], index: 11, kind: input, shape index: {}]   ;;  %s2241_s12 = inlined_call_operand.vmem [shape: f32[1,32], index: 12, kind: input, shape index: {}]   ;;  %s2242_s13 = inlined_call_operand.hbm [shape: f32[16,32], index: 13, kind: output, shape index: {}]  }
   0x1   :  { %19 = vsyncpa [#allocation4], 0  ;;  %s1847_s25 = smov [#allocation2]   ;;  %s1799_s29 = scalar_lea.hbm %s2234_s5, 256 }
   0x2   :  { %s35_s26 = sshll.u32 %s1847_s25, 4  ;;  %p1800_p0 = scmp.ne.s32.totalorder %s2234_s5, %s1799_s29  ;;  %s36_s26 = int_to_ptr.vmem [resolvable:$true] %s35_s26 }
   0x3   :  { %p1803_p1 = scmp.lt.u32.totalorder %s1799_s29, %s2234_s5 }
   0x5   :  { %p1805_p2 = pnand %p1803_p1, %p1800_p0 }
   0x7   :  { %1808 = shalt.err (!%p1805_p2)
}
   0x8   :  { %s1809_s17 = scalar_lea.vmem %s36_s26, 256  ;;  %p1814_p4 = scmp.lt.s32.totalorder %s36_s26, %s36_s26 }
   0x9   :  { %p1810_p3 = scmp.ne.s32.totalorder %s36_s26, %s1809_s17  ;;  %p1815_p5 = scmp.lt.s32.totalorder %s1809_s17, %s1809_s17 }
   0xb   :  { %p1816_p6 = por %p1815_p5, %p1814_p4 }
   0xd   :  { %p1817_p7 = pnand %p1816_p6, %p1810_p3 }
   0xf   :  { %1820 = shalt.err (!%p1817_p7)
}
  0x10   :  { %s1848_s18 = smov 64   ;;  %s1849_s19 = smov 4  }
  0x11   :  { %41 = dma.hbm_to_vmem [thread:$0]  %s2234_s5, 256, %s36_s26, [#allocation3], %s1848_s18, %s1848_s18, %s1849_s19  }
  0x12   :  { %1843 = dma.done.wait [#allocation3], 256  }
  0x13   :  { %1844 = vsyncadd [#allocation3], 4294967040  ;;  %v1850_v0 = vmov 0.0   ;;  %vm1851_vm0 = vmmov 0   ;;  %v1751_v1 = vld [vmem:[%s2230_s1] sm:$0xff]   ;;  %v1752_v2 = vld [vmem:[%s2230_s1 + $0x8] sm:$0xff]  }
  0x14   :  { %1585 = vmatprep.subr.bf16.mxu1 %v1850_v0  ;;  %1589 = vmatprep.mubr.msk.bf16.mxu1 %vm1851_vm0, %v1850_v0  ;;  %v1964_v3 = vld [vmem:[%s2229_s0] sm:$0xff]  ;;  %v1969_v4 = vld [vmem:[%s2229_s0 + $0x8] sm:$0xff]  ;;  %vm86_vm1 = vcmask 261120   ;;  %s1852_s0 = smov 96   ;;  %s1853_s30 = smov 88   ;;  %vm139_vm2 = vcmask 64512  }
  0x15   :  { %1599 = vmatprep.subr.bf16.mxu0 %v1850_v0  ;;  %1601 = vmatprep.mubr.msk.bf16.mxu0 %vm1851_vm0, %v1850_v0  ;;  %v62_v5 = vpack.c.bf16 %v1969_v4, %v1964_v3  ;;  %v1491_v6 = vld [vmem:[%s2231_s2] ss:$0 sm:$0xff]  ;;  %s1854_s2 = smov 120   ;;  %vm259_vm3 = vcmask 1043456   ;;  %s1855_s14 = smov 56   ;;  %vm1381_vm4 = vcmask 523264  }
  0x16   :  { %1586 = vmatpush3.bf16.msra.mxu1 %v1751_v1  ;;  %s1856_s17 = smov 80   ;;  %s1858_s21 = smov 48  }
  0x17   :  { %1587 = vmatprep.subr.bf16.mxu1 %v1850_v0  ;;  %s1859_s22 = smov 72   ;;  %s1860_s23 = smov 104  }
  0x18   :  { %s1861_s25 = smov 40  }
  0x1a   :  { %1588 = vmatpush3.bf16.msra.mxu1 %v1752_v2 }
  0x1b   :  { %1593 = vmatprep.subr.bf16.mxu1 %v1850_v0 }
  0x1d   :  { %1590 = vmatmul.mubr.msk.bf16.vlgmr.msra.gmra.mrb[0].mxu1 %vm86_vm1, %v62_v5 }
  0x1e   :  { %1595 = vmatprep.mubr.msk.bf16.mxu1 %vm1851_vm0, %v1850_v0 }
  0xf0   :  { %v124_v7 = vpop.f32.mrb[0].mxu1 }
  0xf1   :  { %v125_v8 = vadd.f32 %v1491_v6, %v124_v7  ;;  %v1591_v9 = vpop.f32.mrb[1].mxu1 }
  0xf2   :  { %v127_v10 = vpop.f32.mrb[2].mxu1 }
  0xf3   :  { %v1981_v11 = vpack.c.bf16 %v125_v8, %v125_v8  ;;  %v128_v12 = vadd.f32 %v1491_v6, %v127_v10  ;;  %v1592_v13 = vpop.f32.mrb[3].mxu1 }
  0xf5   :  { %137 = vrot.lane.b32.xlu0 %v1981_v11, %s1852_s0  ;;  %v1984_v14 = vpack.c.bf16 %v128_v12, %v128_v12 }
  0xf9   :  { %186 = vrot.lane.b32.xlu0 %v1984_v14, %s1852_s0 }
  0xfd   :  { %254 = vrot.lane.b32.xlu0 %v1981_v11, %s1848_s18 }
 0x101   :  { %359 = vrot.lane.b32.xlu0 %v1981_v11, %s1853_s30 }
 0x105   :  { %409 = vrot.lane.b32.xlu0 %v1984_v14, %s1853_s30 }
 0x109   :  { %357 = vrot.lane.b32.xlu0 %v1981_v11, %s1854_s2 }
 0x10d   :  { %407 = vrot.lane.b32.xlu0 %v1984_v14, %s1854_s2 }
 0x167   :  { %v138_v15 = vpop.permute.xlu0 %137 }
 0x168   :  { %v144_v16 = vsel %vm139_vm2, %v138_v15, 0 }
 0x169   :  { %1594 = vmatpush3.bf16.xpose.msra.mxu1 %v144_v16 }
 0x16a   :  { %1605 = vmatprep.subr.bf16.mxu1 %v1850_v0 }
 0x16b   :  { %v187_v17 = vpop.permute.xlu0 %186 }
 0x16c   :  { %v192_v18 = vsel %vm139_vm2, %v187_v17, 0 }
 0x16d   :  { %1600 = vmatpush3.bf16.xpose.msra.mxu0 %v192_v18 }
 0x16e   :  { %1611 = vmatprep.subr.bf16.mxu0 %v1850_v0 }
 0x16f   :  { %v255_v19 = vpop.permute.xlu0 %254 }
 0x170   :  { %v261_v20 = vsel %vm259_vm3, %v255_v19, 0  ;;  %1596 = vmatmul.mubr.msk.bf16.vlgmr.msra.gmra.mrb[4].mxu1 %vm139_vm2, %v1981_v11 }
 0x171   :  { %1606 = vmatpush3.bf16.msra.mxu1 %v261_v20  ;;  %1607 = vmatprep.mubr.msk.bf16.mxu1 %vm1851_vm0, %v1850_v0 }
 0x172   :  { %1617 = vmatprep.subr.bf16.mxu1 %v1850_v0 }
 0x173   :  { %v360_v39 = vpop.permute.xlu0 %359 }
 0x174   :  { %1602 = vmatmul.mubr.msk.bf16.vlgmr.msra.gmra.mrb[0].mxu0 %vm139_vm2, %v1984_v14  ;;  %v365_v43 = vsel %vm139_vm2, %v360_v39, 0 }
 0x175   :  { %1613 = vmatprep.mubr.msk.bf16.mxu0 %vm1851_vm0, %v1850_v0 }
 0x177   :  { %v410_v42 = vpop.permute.xlu0 %409 }
 0x178   :  { %v415_v46 = vsel %vm139_vm2, %v410_v42, 0 }
 0x17b   :  { %v358_v47 = vpop.permute.xlu0 %357 }
 0x17f   :  { %v408_v48 = vpop.permute.xlu0 %407 }
 0x243   :  { %v180_v21 = vpop.f32.mrb[4].mxu1 }
 0x244   :  { %v1597_v22 = vpop.f32.mrb[5].mxu1  ;;  %v234_v23 = vsel %vm139_vm2, %v180_v21, -inf }
 0x245   :  { %235 = vmax.xlane.f32.xlu1 %v234_v23  ;;  %v183_v24 = vpop.f32.mrb[6].mxu1  ;;  %v356_v23 = vld [vmem:[%s2232_s3] sm:$0xf] }
 0x246   :  { %v1598_v25 = vpop.f32.mrb[7].mxu1 }
 0x247   :  { %v228_v26 = vpop.f32.mrb[0].mxu0 }
 0x248   :  { %v1603_v27 = vpop.f32.mrb[1].mxu0  ;;  %v237_v28 = vsel %vm139_vm2, %v228_v26, -inf }
 0x249   :  { %v231_v29 = vpop.f32.mrb[2].mxu0  ;;  %238 = vmax.xlane.f32.xlu1 %v237_v28  ;;  %v630_v27 = vsel %vm259_vm3, %v356_v23, 0 }
 0x24a   :  { %v1604_v30 = vpop.f32.mrb[3].mxu0 }
 0x25a   :  { %303 = vrot.lane.b32.xlu1 %v1984_v14, %s1848_s18  ;;  %s1857_s18 = smov 112  }
 0x2d2   :  { %v236_v31 = vpop.xlane.xlu1 %235 }
 0x2d3   :  { %v240_v32 = vsub.f32 %v180_v21, %v236_v31 }
 0x2d5   :  { %v242_v33 = vmul.f32 1.442695, %v240_v32 }
 0x2d6   :  { %v239_v34 = vpop.xlane.xlu1 %238 }
 0x2d7   :  { %1759 = vpow2.f32 %v242_v33  ;;  %v241_v35 = vsub.f32 %v228_v26, %v239_v34 }
 0x2d9   :  { %v244_v36 = vmul.f32 1.442695, %v241_v35  ;;  %v578_v35 = vld [vmem:[%s2232_s3 + $0x4] sm:$0xf] }
 0x2da   :  { %v304_v37 = vpop.permute.xlu1 %303 }
 0x2db   :  { %1761 = vpow2.f32 %v244_v36  ;;  %v309_v38 = vsel %vm259_vm3, %v304_v37, 0  ;;  %v583_v36 = vsel %vm259_vm3, %v578_v35, 0 }
 0x2dc   :  { %1612 = vmatpush3.bf16.msra.mxu0 %v309_v38 }
 0x2dd   :  { %1623 = vmatprep.subr.bf16.mxu0 %v1850_v0 }
 0x2e1   :  { %v1760_v40 = vpop.eup %1759 }
 0x2e2   :  { %v252_v41 = vpack.c.bf16 %v1760_v40, %v1760_v40  ;;  %v246_v6 = vsel %vm139_vm2, %v1760_v40, 0.0 }
 0x2e4   :  { %1608 = vmatmul.mubr.msk.bf16.vlgmr.msra.gmra.mrb[8].mxu1 %vm139_vm2, %v252_v41 }
 0x2e5   :  { %v1762_v44 = vpop.eup %1761  ;;  %1618 = vmatpush3.bf16.xpose.msra.mxu1 %v365_v43  ;;  %1619 = vmatprep.mubr.msk.bf16.mxu1 %vm1851_vm0, %v1850_v0 }
 0x2e6   :  { %v253_v45 = vpack.c.bf16 %v1762_v44, %v1762_v44  ;;  %1629 = vmatprep.subr.bf16.mxu1 %v1850_v0  ;;  %v249_v7 = vsel %vm139_vm2, %v1762_v44, 0.0 }
 0x2e8   :  { %1614 = vmatmul.mubr.msk.bf16.vlgmr.msra.gmra.mrb[4].mxu0 %vm139_vm2, %v253_v45 }
 0x2e9   :  { %1624 = vmatpush3.bf16.xpose.msra.mxu0 %v415_v46  ;;  %1625 = vmatprep.mubr.msk.bf16.mxu0 %vm1851_vm0, %v1850_v0 }
 0x2ea   :  { %1635 = vmatprep.subr.bf16.mxu0 %v1850_v0 }
 0x2ec   :  { %1620 = vmatmul.mubr.msk.bf16.vlgmr.msra.gmra.mrb[12].mxu1 %vm139_vm2, %v358_v47 }
 0x2ed   :  { %1631 = vmatprep.mubr.msk.bf16.mxu1 %vm1851_vm0, %v1850_v0 }
 0x2f0   :  { %1626 = vmatmul.mubr.msk.bf16.vlgmr.msra.gmra.mrb[8].mxu0 %vm139_vm2, %v408_v48 }
 0x2f1   :  { %1637 = vmatprep.mubr.msk.bf16.mxu0 %vm1851_vm0, %v1850_v0 }
 0x3b7   :  { %v2029_v49 = vpop.f32.mrb[8].mxu1 }
 0x3b8   :  { %v1609_v50 = vpop.f32.mrb[9].mxu1 }
 0x3b9   :  { %v300_v51 = vpop.f32.mrb[10].mxu1 }
 0x3ba   :  { %v1610_v52 = vpop.f32.mrb[11].mxu1 }
 0x3bb   :  { %v2031_v53 = vpop.f32.mrb[4].mxu0 }
 0x3bc   :  { %v1615_v54 = vpop.f32.mrb[5].mxu0 }
 0x3bd   :  { %v348_v55 = vpop.f32.mrb[6].mxu0 }
 0x3be   :  { %v1616_v56 = vpop.f32.mrb[7].mxu0 }
 0x3bf   :  { %v401_v57 = vpop.f32.mrb[12].mxu1 }
 0x3c0   :  { %v1621_v58 = vpop.f32.mrb[13].mxu1  ;;  %v457_v59 = vsel %vm139_vm2, %v401_v57, -inf }
 0x3c1   :  { %458 = vmax.xlane.f32.xlu1 %v457_v59  ;;  %v404_v60 = vpop.f32.mrb[14].mxu1 }
 0x3c2   :  { %v1622_v61 = vpop.f32.mrb[15].mxu1 }
 0x3c3   :  { %v451_v62 = vpop.f32.mrb[8].mxu0 }
 0x3c4   :  { %v1627_v63 = vpop.f32.mrb[9].mxu0  ;;  %v460_v1 = vsel %vm139_vm2, %v451_v62, -inf }
 0x3c5   :  { %461 = vmax.xlane.f32.xlu0 %v460_v1  ;;  %v454_v2 = vpop.f32.mrb[10].mxu0 }
 0x3c6   :  { %v1628_v5 = vpop.f32.mrb[11].mxu0 }
 0x3d2   :  { %525 = vrot.lane.b32.xlu1 %v1984_v14, %s1855_s14 }
 0x3db   :  { %477 = vrot.lane.b32.xlu0 %v1981_v11, %s1855_s14 }
 0x3f6   :  { %247 = vadd.xlane.f32.xlu1 %v246_v6 }
 0x3fa   :  { %250 = vadd.xlane.f32.xlu0 %v249_v7 }
 0x44e   :  { %v459_v8 = vpop.xlane.xlu1 %458 }
 0x44f   :  { %v463_v9 = vsub.f32 %v401_v57, %v459_v8 }
 0x451   :  { %v465_v10 = vmul.f32 1.442695, %v463_v9 }
 0x452   :  { %v462_v12 = vpop.xlane.xlu0 %461  ;;  %v526_v13 = vpop.permute.xlu1 %525 }
 0x453   :  { %1763 = vpow2.f32 %v465_v10  ;;  %v464_v15 = vsub.f32 %v451_v62, %v462_v12  ;;  %v531_v16 = vsel %vm259_vm3, %v526_v13, 0 }
 0x454   :  { %1636 = vmatpush3.bf16.msra.mxu0 %v531_v16 }
 0x455   :  { %v467_v17 = vmul.f32 1.442695, %v464_v15  ;;  %1647 = vmatprep.subr.bf16.mxu0 %v1850_v0 }
 0x456   :  { %v478_v18 = vpop.permute.xlu0 %477 }
 0x457   :  { %1765 = vpow2.f32 %v467_v17  ;;  %v483_v19 = vsel %vm259_vm3, %v478_v18, 0 }
 0x458   :  { %1630 = vmatpush3.bf16.msra.mxu1 %v483_v19 }
 0x459   :  { %1641 = vmatprep.subr.bf16.mxu1 %v1850_v0 }
 0x45d   :  { %v1764_v20 = vpop.eup %1763 }
 0x45e   :  { %v469_v21 = vsel %vm139_vm2, %v1764_v20, 0.0  ;;  %v475_v22 = vpack.c.bf16 %v1764_v20, %v1764_v20 }
 0x45f   :  { %470 = vadd.xlane.f32.xlu0 %v469_v21 }
 0x460   :  { %1632 = vmatmul.mubr.msk.bf16.vlgmr.msra.gmra.mrb[16].mxu1 %vm139_vm2, %v475_v22 }
 0x461   :  { %v1766_v24 = vpop.eup %1765  ;;  %1643 = vmatprep.mubr.msk.bf16.mxu1 %vm1851_vm0, %v1850_v0  ;;  %1642 = vmatpush3.bf16.msra.mxu1 %v583_v36 }
 0x462   :  { %v472_v25 = vsel %vm139_vm2, %v1766_v24, 0.0  ;;  %v476_v26 = vpack.c.bf16 %v1766_v24, %v1766_v24  ;;  %1653 = vmatprep.subr.bf16.mxu1 %v1850_v0 }
 0x463   :  { %473 = vadd.xlane.f32.xlu1 %v472_v25 }
 0x464   :  { %1638 = vmatmul.mubr.msk.bf16.vlgmr.msra.gmra.mrb[12].mxu0 %vm139_vm2, %v476_v26 }
 0x465   :  { %1648 = vmatpush3.bf16.msra.mxu0 %v630_v27  ;;  %1649 = vmatprep.mubr.msk.bf16.mxu0 %vm1851_vm0, %v1850_v0 }
 0x466   :  { %1659 = vmatprep.subr.bf16.mxu0 %v1850_v0 }
 0x474   :  { %725 = vrot.lane.b32.xlu1 %v1984_v14, %s1856_s17 }
 0x475   :  { %675 = vrot.lane.b32.xlu0 %v1981_v11, %s1856_s17 }
 0x478   :  { %673 = vrot.lane.b32.xlu1 %v1981_v11, %s1857_s18 }
 0x479   :  { %723 = vrot.lane.b32.xlu0 %v1984_v14, %s1857_s18 }
 0x483   :  { %v248_v28 = vpop.xlane.xlu1 %247 }
 0x484   :  { %1767 = vrcp.f32 %v248_v28 }
 0x487   :  { %v251_v29 = vpop.xlane.xlu0 %250 }
 0x488   :  { %1769 = vrcp.f32 %v251_v29 }
 0x48e   :  { %v1768_v30 = vpop.eup %1767 }
 0x48f   :  { %v353_v32 = vmul.f32 %v1768_v30, %v2029_v49 }
 0x492   :  { %v1770_v31 = vpop.eup %1769 }
 0x493   :  { %v354_v33 = vmul.f32 %v1770_v31, %v2031_v53 }
 0x495   :  { %v355_v34 = vpack.c.bf16 %v354_v33, %v353_v32 }
 0x497   :  { %1650 = vmatmul.mubr.msk.bf16.vlgmr.msra.gmra.mrb[16].mxu0 %vm139_vm2, %v355_v34 }
 0x498   :  { %1661 = vmatprep.mubr.msk.bf16.mxu0 %vm1851_vm0, %v1850_v0 }
 0x4ec   :  { %v471_v37 = vpop.xlane.xlu0 %470 }
 0x4ed   :  { %1771 = vrcp.f32 %v471_v37 }
 0x4f0   :  { %v474_v38 = vpop.xlane.xlu1 %473  ;;  %v676_v41 = vpop.permute.xlu0 %675 }
 0x4f1   :  { %1773 = vrcp.f32 %v474_v38  ;;  %v681_v56 = vsel %vm139_vm2, %v676_v41, 0  ;;  %v894_v38 = vld [vmem:[%s2232_s3 + $0x8] sm:$0xf] }
 0x4f4   :  { %v726_v39 = vpop.permute.xlu1 %725  ;;  %v724_v42 = vpop.permute.xlu0 %723 }
 0x4f5   :  { %v731_v40 = vsel %vm139_vm2, %v726_v39, 0  ;;  %v899_v39 = vsel %vm259_vm3, %v894_v38, 0 }
 0x4f6   :  { %1660 = vmatpush3.bf16.xpose.msra.mxu0 %v731_v40 }
 0x4f7   :  { %1671 = vmatprep.subr.bf16.mxu0 %v1850_v0  ;;  %v1772_v46 = vpop.eup %1771 }
 0x4f8   :  { %v674_v57 = vpop.permute.xlu1 %673 }
 0x4fb   :  { %v1774_v48 = vpop.eup %1773 }
 0x4fd   :  { %1662 = vmatmul.mubr.msk.bf16.vlgmr.msra.gmra.mrb[20].mxu0 %vm139_vm2, %v724_v42 }
 0x4fe   :  { %1673 = vmatprep.mubr.msk.bf16.mxu0 %vm1851_vm0, %v1850_v0 }
 0x533   :  { %v519_v43 = vpop.f32.mrb[16].mxu1 }
 0x534   :  { %v1633_v44 = vpop.f32.mrb[17].mxu1  ;;  %v575_v50 = vmul.f32 %v1772_v46, %v519_v43 }
 0x535   :  { %v522_v45 = vpop.f32.mrb[18].mxu1 }
 0x536   :  { %v1634_v47 = vpop.f32.mrb[19].mxu1 }
 0x537   :  { %v567_v49 = vpop.f32.mrb[12].mxu0 }
 0x538   :  { %v576_v51 = vmul.f32 %v1774_v48, %v567_v49  ;;  %v1639_v52 = vpop.f32.mrb[13].mxu0 }
 0x539   :  { %v570_v53 = vpop.f32.mrb[14].mxu0 }
 0x53a   :  { %v577_v54 = vpack.c.bf16 %v576_v51, %v575_v50  ;;  %v1640_v55 = vpop.f32.mrb[15].mxu0 }
 0x53c   :  { %1644 = vmatmul.mubr.msk.bf16.vlgmr.msra.gmra.mrb[20].mxu1 %vm139_vm2, %v577_v54 }
 0x53d   :  { %1654 = vmatpush3.bf16.xpose.msra.mxu1 %v681_v56  ;;  %1655 = vmatprep.mubr.msk.bf16.mxu1 %vm1851_vm0, %v1850_v0 }
 0x53e   :  { %1665 = vmatprep.subr.bf16.mxu1 %v1850_v0 }
 0x544   :  { %1656 = vmatmul.mubr.msk.bf16.vlgmr.msra.gmra.mrb[24].mxu1 %vm139_vm2, %v674_v57 }
 0x545   :  { %1667 = vmatprep.mubr.msk.bf16.mxu1 %vm1851_vm0, %v1850_v0 }
 0x56a   :  { %v666_v58 = vpop.f32.mrb[16].mxu0 }
 0x56b   :  { %v1651_v59 = vpop.f32.mrb[17].mxu0 }
 0x56c   :  { %v669_v60 = vpop.f32.mrb[18].mxu0 }
 0x56d   :  { %v1652_v61 = vpop.f32.mrb[19].mxu0 }
 0x5d0   :  { %v767_v62 = vpop.f32.mrb[20].mxu0 }
 0x5d1   :  { %v1663_v63 = vpop.f32.mrb[21].mxu0  ;;  %v776_v1 = vsel %vm139_vm2, %v767_v62, -inf }
 0x5d2   :  { %777 = vmax.xlane.f32.xlu0 %v776_v1  ;;  %v770_v2 = vpop.f32.mrb[22].mxu0 }
 0x5d3   :  { %v1664_v5 = vpop.f32.mrb[23].mxu0 }
 0x5e8   :  { %793 = vrot.lane.b32.xlu0 %v1981_v11, %s1858_s21 }
 0x60f   :  { %v619_v6 = vpop.f32.mrb[20].mxu1 }
 0x610   :  { %v2085_v7 = vadd.f32 %v666_v58, %v619_v6  ;;  %v1645_v8 = vpop.f32.mrb[21].mxu1 }
 0x611   :  { %v622_v9 = vpop.f32.mrb[22].mxu1 }
 0x612   :  { %v2087_v10 = vadd.f32 %v669_v60, %v622_v9  ;;  %v1646_v12 = vpop.f32.mrb[23].mxu1 }
 0x617   :  { %v717_v13 = vpop.f32.mrb[24].mxu1 }
 0x618   :  { %v1657_v15 = vpop.f32.mrb[25].mxu1  ;;  %v773_v16 = vsel %vm139_vm2, %v717_v13, -inf }
 0x619   :  { %774 = vmax.xlane.f32.xlu1 %v773_v16  ;;  %v720_v17 = vpop.f32.mrb[26].mxu1 }
 0x61a   :  { %v1658_v18 = vpop.f32.mrb[27].mxu1 }
 0x62a   :  { %841 = vrot.lane.b32.xlu1 %v1984_v14, %s1858_s21 }
 0x65f   :  { %v778_v19 = vpop.xlane.xlu0 %777 }
 0x660   :  { %v780_v20 = vsub.f32 %v767_v62, %v778_v19 }
 0x662   :  { %v783_v21 = vmul.f32 1.442695, %v780_v20 }
 0x663   :  { %v794_v22 = vpop.permute.xlu0 %793 }
 0x664   :  { %1775 = vpow2.f32 %v783_v21  ;;  %v799_v23 = vsel %vm259_vm3, %v794_v22, 0 }
 0x665   :  { %1666 = vmatpush3.bf16.msra.mxu1 %v799_v23 }
 0x666   :  { %1677 = vmatprep.subr.bf16.mxu1 %v1850_v0 }
 0x66e   :  { %v1776_v24 = vpop.eup %1775 }
 0x66f   :  { %v788_v25 = vsel %vm139_vm2, %v1776_v24, 0.0  ;;  %v792_v31 = vpack.c.bf16 %v1776_v24, %v1776_v24 }
 0x670   :  { %789 = vadd.xlane.f32.xlu0 %v788_v25 }
 0x686   :  { %946 = vrot.lane.b32.xlu0 %v1981_v11, %s1859_s22 }
 0x68a   :  { %994 = vrot.lane.b32.xlu0 %v1984_v14, %s1860_s23 }
 0x6a6   :  { %v775_v26 = vpop.xlane.xlu1 %774 }
 0x6a7   :  { %v779_v27 = vsub.f32 %v717_v13, %v775_v26 }
 0x6a9   :  { %v781_v28 = vmul.f32 1.442695, %v779_v27 }
 0x6aa   :  { %v842_v29 = vpop.permute.xlu1 %841 }
 0x6ab   :  { %1777 = vpow2.f32 %v781_v28  ;;  %v847_v30 = vsel %vm259_vm3, %v842_v29, 0  ;;  %v1165_v29 = vld [vmem:[%s2232_s3 + $0xc] sm:$0xf] }
 0x6ac   :  { %1672 = vmatpush3.bf16.msra.mxu0 %v847_v30  ;;  %v1170_v30 = vsel %vm259_vm3, %v1165_v29, 0  ;;  %v1520_v29 = vld [vmem:[%s2235_s6] ss:$0 sm:$0xff] }
 0x6ad   :  { %1683 = vmatprep.subr.bf16.mxu0 %v1850_v0 }
 0x6af   :  { %1674 = vmatmul.mubr.msk.bf16.vlgmr.msra.gmra.mrb[24].mxu0 %vm139_vm2, %v792_v31 }
 0x6b0   :  { %1685 = vmatprep.mubr.msk.bf16.mxu0 %vm1851_vm0, %v1850_v0 }
 0x6b5   :  { %v1778_v32 = vpop.eup %1777 }
 0x6b6   :  { %v785_v33 = vsel %vm139_vm2, %v1778_v32, 0.0  ;;  %v791_v34 = vpack.c.bf16 %v1778_v32, %v1778_v32 }
 0x6b7   :  { %786 = vadd.xlane.f32.xlu1 %v785_v33 }
 0x6b8   :  { %1668 = vmatmul.mubr.msk.bf16.vlgmr.msra.gmra.mrb[28].mxu1 %vm139_vm2, %v791_v34 }
 0x6b9   :  { %1679 = vmatprep.mubr.msk.bf16.mxu1 %vm1851_vm0, %v1850_v0  ;;  %1678 = vmatpush3.bf16.msra.mxu1 %v899_v39 }
 0x6ba   :  { %1689 = vmatprep.subr.bf16.mxu1 %v1850_v0 }
 0x6c8   :  { %996 = vrot.lane.b32.xlu1 %v1984_v14, %s1859_s22 }
 0x6cc   :  { %944 = vrot.lane.b32.xlu1 %v1981_v11, %s1860_s23  ;;  %s1862_s23 = smov [#allocation5]  }
 0x6cd   :  { %s1479_s5 = sshll.u32 %s1862_s23, 4  ;;  %s1480_s5 = int_to_ptr.vmem [resolvable:$true] %s1479_s5 }
 0x6ce   :  { %s1821_s24 = scalar_lea.vmem %s1480_s5, 256  ;;  %p1826_p9 = scmp.lt.s32.totalorder %s1480_s5, %s1480_s5 }
 0x6cf   :  { %p1822_p8 = scmp.ne.s32.totalorder %s1480_s5, %s1821_s24  ;;  %p1827_p10 = scmp.lt.s32.totalorder %s1821_s24, %s1821_s24 }
 0x6d1   :  { %p1828_p11 = por %p1827_p10, %p1826_p9 }
 0x6d3   :  { %p1829_p12 = pnand %p1828_p11, %p1822_p8 }
 0x6fd   :  { %v790_v35 = vpop.xlane.xlu0 %789 }
 0x6fe   :  { %1779 = vrcp.f32 %v790_v35 }
 0x701   :  { %v947_v36 = vpop.permute.xlu0 %946 }
 0x702   :  { %v952_v37 = vsel %vm139_vm2, %v947_v36, 0 }
 0x703   :  { %1684 = vmatpush3.bf16.xpose.msra.mxu0 %v952_v37 }
 0x704   :  { %1695 = vmatprep.subr.bf16.mxu0 %v1850_v0 }
 0x705   :  { %v995_v57 = vpop.permute.xlu0 %994 }
 0x708   :  { %v1780_v43 = vpop.eup %1779 }
 0x744   :  { %v787_v40 = vpop.xlane.xlu1 %786 }
 0x745   :  { %1781 = vrcp.f32 %v787_v40 }
 0x748   :  { %v997_v41 = vpop.permute.xlu1 %996 }
 0x749   :  { %v1002_v56 = vsel %vm139_vm2, %v997_v41, 0 }
 0x74c   :  { %v945_v42 = vpop.permute.xlu1 %944 }
 0x74d   :  { %1686 = vmatmul.mubr.msk.bf16.vlgmr.msra.gmra.mrb[28].mxu0 %vm139_vm2, %v945_v42 }
 0x74e   :  { %1697 = vmatprep.mubr.msk.bf16.mxu0 %vm1851_vm0, %v1850_v0 }
 0x74f   :  { %v1782_v49 = vpop.eup %1781 }
 0x782   :  { %v883_v44 = vpop.f32.mrb[24].mxu0 }
 0x783   :  { %v892_v45 = vmul.f32 %v1780_v43, %v883_v44  ;;  %v1675_v46 = vpop.f32.mrb[25].mxu0 }
 0x784   :  { %v886_v47 = vpop.f32.mrb[26].mxu0 }
 0x785   :  { %v1676_v48 = vpop.f32.mrb[27].mxu0  ;;  %v1517_v47 = vld [vmem:[%s2233_s4] ss:$0 sm:$0xff] }
 0x78b   :  { %v835_v50 = vpop.f32.mrb[28].mxu1 }
 0x78c   :  { %v891_v51 = vmul.f32 %v1782_v49, %v835_v50  ;;  %v1669_v52 = vpop.f32.mrb[29].mxu1 }
 0x78d   :  { %v838_v53 = vpop.f32.mrb[30].mxu1 }
 0x78e   :  { %v893_v54 = vpack.c.bf16 %v892_v45, %v891_v51  ;;  %v1670_v55 = vpop.f32.mrb[31].mxu1 }
 0x790   :  { %1680 = vmatmul.mubr.msk.bf16.vlgmr.msra.gmra.mrb[32].mxu1 %vm139_vm2, %v893_v54 }
 0x791   :  { %1690 = vmatpush3.bf16.xpose.msra.mxu1 %v1002_v56  ;;  %1691 = vmatprep.mubr.msk.bf16.mxu1 %vm1851_vm0, %v1850_v0 }
 0x792   :  { %1701 = vmatprep.subr.bf16.mxu1 %v1850_v0 }
 0x798   :  { %1692 = vmatmul.mubr.msk.bf16.vlgmr.msra.gmra.mrb[36].mxu1 %vm139_vm2, %v995_v57 }
 0x799   :  { %1703 = vmatprep.mubr.msk.bf16.mxu1 %vm1851_vm0, %v1850_v0 }
 0x820   :  { %v988_v58 = vpop.f32.mrb[28].mxu0 }
 0x821   :  { %v1687_v59 = vpop.f32.mrb[29].mxu0  ;;  %v1044_v60 = vsel %vm139_vm2, %v988_v58, -inf }
 0x822   :  { %1045 = vmax.xlane.f32.xlu1 %v1044_v60  ;;  %v991_v61 = vpop.f32.mrb[30].mxu0 }
 0x823   :  { %v1688_v62 = vpop.f32.mrb[31].mxu0 }
 0x833   :  { %1112 = vrot.lane.b32.xlu1 %v1984_v14, %s1861_s25 }
 0x863   :  { %v935_v63 = vpop.f32.mrb[32].mxu1 }
 0x864   :  { %v2128_v1 = vadd.f32 %v935_v63, %v2085_v7  ;;  %v1681_v2 = vpop.f32.mrb[33].mxu1 }
 0x865   :  { %v938_v5 = vpop.f32.mrb[34].mxu1 }
 0x866   :  { %v2131_v6 = vadd.f32 %v938_v5, %v2087_v10  ;;  %v1682_v8 = vpop.f32.mrb[35].mxu1 }
 0x867   :  { %v1754_v8 = vld [vmem:[#allocation2 + $0x8] sm:$0xff]  }
 0x86b   :  { %v1038_v9 = vpop.f32.mrb[36].mxu1 }
 0x86c   :  { %v1693_v12 = vpop.f32.mrb[37].mxu1  ;;  %v1047_v13 = vsel %vm139_vm2, %v1038_v9, -inf }
 0x86d   :  { %1048 = vmax.xlane.f32.xlu0 %v1047_v13  ;;  %v1041_v15 = vpop.f32.mrb[38].mxu1  ;;  %v1756_v12 = vld [vmem:[%s2236_s7 + $0x8] sm:$0xff]  }
 0x86e   :  { %v1694_v16 = vpop.f32.mrb[39].mxu1 }
 0x883   :  { %1064 = vrot.lane.b32.xlu0 %v1981_v11, %s1861_s25 }
 0x8af   :  { %v1046_v14 = vpop.xlane.xlu1 %1045 }
 0x8b0   :  { %v1050_v17 = vsub.f32 %v988_v58, %v1046_v14 }
 0x8b2   :  { %v1052_v18 = vmul.f32 1.442695, %v1050_v17 }
 0x8b3   :  { %v1113_v7 = vpop.permute.xlu1 %1112 }
 0x8b4   :  { %1783 = vpow2.f32 %v1052_v18  ;;  %v1118_v19 = vsel %vm259_vm3, %v1113_v7, 0 }
 0x8b5   :  { %1702 = vmatpush3.bf16.msra.mxu1 %v1118_v19  ;;  %v1518_v19 = vld [vmem:[%s2238_s9] ss:$0 sm:$0xff] }
 0x8b6   :  { %1713 = vmatprep.subr.bf16.mxu1 %v1850_v0 }
 0x8be   :  { %v1784_v10 = vpop.eup %1783 }
 0x8bf   :  { %v1056_v20 = vsel %vm139_vm2, %v1784_v10, 0.0  ;;  %v1062_v25 = vpack.c.bf16 %v1784_v10, %v1784_v10 }
 0x8c0   :  { %1057 = vadd.xlane.f32.xlu1 %v1056_v20 }
 0x8fa   :  { %v1049_v21 = vpop.xlane.xlu0 %1048 }
 0x8fb   :  { %v1051_v22 = vsub.f32 %v1038_v9, %v1049_v21  ;;  %v1755_v9 = vld [vmem:[%s2236_s7] sm:$0xff]  }
 0x8fd   :  { %v1054_v23 = vmul.f32 1.442695, %v1051_v22 }
 0x8fe   :  { %v1065_v24 = vpop.permute.xlu0 %1064 }
 0x8ff   :  { %1785 = vpow2.f32 %v1054_v23  ;;  %v1070_v11 = vsel %vm259_vm3, %v1065_v24, 0  ;;  %v1519_v23 = vld [vmem:[%s2239_s10] ss:$0 sm:$0xff] }
 0x900   :  { %1696 = vmatpush3.bf16.msra.mxu0 %v1070_v11 }
 0x901   :  { %1707 = vmatprep.subr.bf16.mxu0 %v1850_v0 }
 0x903   :  { %1698 = vmatmul.mubr.msk.bf16.vlgmr.msra.gmra.mrb[32].mxu0 %vm139_vm2, %v1062_v25 }
 0x904   :  { %1709 = vmatprep.mubr.msk.bf16.mxu0 %vm1851_vm0, %v1850_v0  ;;  %1708 = vmatpush3.bf16.msra.mxu0 %v1170_v30 }
 0x905   :  { %1721 = vmatprep.subr.bf16.mxu0 %v1850_v0 }
 0x909   :  { %v1786_v26 = vpop.eup %1785 }
 0x90a   :  { %v1059_v27 = vsel %vm139_vm2, %v1786_v26, 0.0  ;;  %v1063_v28 = vpack.c.bf16 %v1786_v26, %v1786_v26 }
 0x90b   :  { %1060 = vadd.xlane.f32.xlu0 %v1059_v27  ;;  %v1757_v27 = vld [vmem:[%s2236_s7 + $0x10] sm:$0xff]  }
 0x90c   :  { %1704 = vmatmul.mubr.msk.bf16.vlgmr.msra.gmra.mrb[40].mxu1 %vm139_vm2, %v1063_v28  ;;  %v1758_v28 = vld [vmem:[%s2236_s7 + $0x18] sm:$0xff]  }
 0x90d   :  { %1717 = vmatprep.mubr.msk.bf16.mxu1 %vm1851_vm0, %v1850_v0 }
 0x94d   :  { %v1058_v31 = vpop.xlane.xlu1 %1057 }
 0x94e   :  { %1787 = vrcp.f32 %v1058_v31 }
 0x958   :  { %v1788_v37 = vpop.eup %1787 }
 0x998   :  { %v1061_v32 = vpop.xlane.xlu0 %1060 }
 0x999   :  { %1789 = vrcp.f32 %v1061_v32 }
 0x9a3   :  { %v1790_v38 = vpop.eup %1789 }
 0x9d6   :  { %v1106_v33 = vpop.f32.mrb[32].mxu0 }
 0x9d7   :  { %v1699_v34 = vpop.f32.mrb[33].mxu0  ;;  %v1162_v40 = vmul.f32 %v1788_v37, %v1106_v33 }
 0x9d8   :  { %v1109_v35 = vpop.f32.mrb[34].mxu0 }
 0x9d9   :  { %v1700_v36 = vpop.f32.mrb[35].mxu0 }
 0x9df   :  { %v1154_v39 = vpop.f32.mrb[40].mxu1 }
 0x9e0   :  { %v1163_v41 = vmul.f32 %v1790_v38, %v1154_v39  ;;  %v1705_v42 = vpop.f32.mrb[41].mxu1 }
 0x9e1   :  { %v1157_v43 = vpop.f32.mrb[42].mxu1 }
 0x9e2   :  { %v1164_v44 = vpack.c.bf16 %v1163_v41, %v1162_v40  ;;  %v1706_v45 = vpop.f32.mrb[43].mxu1 }
 0x9e4   :  { %1710 = vmatmul.mubr.msk.bf16.vlgmr.msra.gmra.mrb[36].mxu0 %vm139_vm2, %v1164_v44 }
 0x9e5   :  { %1729 = vmatprep.mubr.msk.bf16.mxu0 %vm1851_vm0, %v1850_v0  ;;  %1722 = vmatpush3.bf16.msra.mxu0 %v1755_v9 }
 0x9e6   :  { %1723 = vmatprep.subr.bf16.mxu0 %v1850_v0 }
 0x9e9   :  { %1724 = vmatpush3.bf16.msra.mxu0 %v1756_v12 }
 0x9ea   :  { %1725 = vmatprep.subr.bf16.mxu0 %v1850_v0 }
 0x9ed   :  { %1726 = vmatpush3.bf16.msra.mxu0 %v1757_v27 }
 0x9ee   :  { %1727 = vmatprep.subr.bf16.mxu0 %v1850_v0 }
 0x9f1   :  { %1728 = vmatpush3.bf16.msra.mxu0 %v1758_v28 }
 0xab7   :  { %v1206_v46 = vpop.f32.mrb[36].mxu0 }
 0xab8   :  { %v1213_v48 = vadd.f32 %v1206_v46, %v2128_v1  ;;  %v1711_v49 = vpop.f32.mrb[37].mxu0 }
 0xab9   :  { %v1209_v50 = vpop.f32.mrb[38].mxu0 }
 0xaba   :  { %v1222_v51 = vadd.f32 %v1517_v47, %v1213_v48  ;;  %v1214_v52 = vadd.f32 %v1209_v50, %v2131_v6  ;;  %v1712_v53 = vpop.f32.mrb[39].mxu0  ;;  %v1753_v6 = vld [vmem:[#allocation2] sm:$0xff]  }
 0xabb   :  { %1714 = vmatpush3.bf16.msra.mxu1 %v1753_v6  ;;  %v1531_v6 = vld [vmem:[%s2241_s12] ss:$0 sm:$0xff] }
 0xabc   :  { %v2161_v54 = vadd.f32 %v1222_v51, %v1964_v3  ;;  %v1223_v55 = vadd.f32 %v1517_v47, %v1214_v52  ;;  %1715 = vmatprep.subr.bf16.mxu1 %v1850_v0  ;;  %v1524_v0 = vld [vmem:[%s2237_s8] ss:$0 sm:$0xff] }
 0xabe   :  { %v2164_v56 = vadd.f32 %v1223_v55, %v1969_v4  ;;  %v1226_v57 = vsel %vm86_vm1, %v2161_v54, 0.0 }
 0xabf   :  { %1227 = vadd.xlane.f32.xlu0 %v1226_v57  ;;  %1716 = vmatpush3.bf16.msra.mxu1 %v1754_v8 }
 0xac0   :  { %v1229_v58 = vsel %vm86_vm1, %v2164_v56, 0.0 }
 0xac1   :  { %1230 = vadd.xlane.f32.xlu1 %v1229_v58 }
 0xb4c   :  { %v1228_v59 = vpop.xlane.xlu0 %1227 }
 0xb4d   :  { %v1233_v60 = vmul.f32 0.03125, %v1228_v59 }
 0xb4e   :  { %v1231_v61 = vpop.xlane.xlu1 %1230 }
 0xb4f   :  { %v1235_v62 = vsub.f32 %v2161_v54, %v1233_v60  ;;  %v1234_v63 = vmul.f32 0.03125, %v1231_v61 }
 0xb51   :  { %v1236_v3 = vsub.f32 %v2164_v56, %v1234_v63  ;;  %v1237_v1 = vmul.f32 %v1235_v62, %v1235_v62 }
 0xb53   :  { %v1239_v4 = vsel %vm86_vm1, %v1237_v1, 0.0  ;;  %v1238_v2 = vmul.f32 %v1236_v3, %v1236_v3 }
 0xb54   :  { %1240 = vadd.xlane.f32.xlu0 %v1239_v4  ;;  %v1530_v4 = vld [vmem:[%s2240_s11] ss:$0 sm:$0xff] }
 0xb55   :  { %v1242_v5 = vsel %vm86_vm1, %v1238_v2, 0.0 }
 0xb56   :  { %1243 = vadd.xlane.f32.xlu1 %v1242_v5 }
 0xbe1   :  { %v1241_v13 = vpop.xlane.xlu0 %1240 }
 0xbe2   :  { %v1245_v15 = vmul.f32 0.03125, %v1241_v13 }
 0xbe3   :  { %v1244_v16 = vpop.xlane.xlu1 %1243 }
 0xbe4   :  { %v1247_v14 = vadd.f32 1e-05, %v1245_v15  ;;  %v1246_v17 = vmul.f32 0.03125, %v1244_v16 }
 0xbe6   :  { %1791 = vrsqrt.f32 %v1247_v14  ;;  %v1248_v18 = vadd.f32 1e-05, %v1246_v17 }
 0xbe8   :  { %1793 = vrsqrt.f32 %v1248_v18 }
 0xbf0   :  { %v1792_v7 = vpop.eup %1791 }
 0xbf1   :  { %v1251_v10 = vmul.f32 %v1792_v7, %v1235_v62 }
 0xbf2   :  { %v1794_v20 = vpop.eup %1793 }
 0xbf3   :  { %v1260_v21 = vmul.f32 %v1518_v19, %v1251_v10  ;;  %v1252_v22 = vmul.f32 %v1794_v20, %v1236_v3 }
 0xbf5   :  { %v1261_v24 = vmul.f32 %v1518_v19, %v1252_v22  ;;  %v1269_v11 = vadd.f32 %v1519_v23, %v1260_v21 }
 0xbf7   :  { %v1270_v25 = vadd.f32 %v1519_v23, %v1261_v24 }
 0xbf9   :  { %v1271_v26 = vpack.c.bf16 %v1270_v25, %v1269_v11 }
 0xbfb   :  { %1718 = vmatmul.mubr.msk.bf16.vlgmr.msra.gmra.mrb[44].mxu1 %vm86_vm1, %v1271_v26 }
 0xcce   :  { %v1332_v30 = vpop.f32.mrb[44].mxu1 }
 0xccf   :  { %v1333_v31 = vadd.f32 %v1520_v29, %v1332_v30  ;;  %v1719_v32 = vpop.f32.mrb[45].mxu1 }
 0xcd0   :  { %v1335_v33 = vpop.f32.mrb[46].mxu1 }
 0xcd1   :  { %v1336_v34 = vadd.f32 %v1520_v29, %v1335_v33  ;;  %v1720_v35 = vpop.f32.mrb[47].mxu1  ;;  %v1339_v36 = vmax.f32 %v1333_v31, 0.0 }
 0xcd3   :  { %v1340_v37 = vmax.f32 %v1336_v34, 0.0 }
 0xcd5   :  { %v1341_v38 = vpack.c.bf16 %v1340_v37, %v1339_v36 }
 0xcd7   :  { %1730 = vmatmul.mubr.msk.bf16.vlgmr.msra.gmra.mrb[40].mxu0 %vm1381_vm4, %v1341_v38 }
 0xdaa   :  { %v1419_v39 = vpop.f32.mrb[40].mxu0 }
 0xdab   :  { %v1420_v40 = vadd.f32 %v1524_v0, %v1419_v39  ;;  %v1731_v41 = vpop.f32.mrb[41].mxu0 }
 0xdac   :  { %v1422_v42 = vpop.f32.mrb[42].mxu0 }
 0xdad   :  { %v1423_v43 = vadd.f32 %v1524_v0, %v1422_v42  ;;  %v1732_v44 = vpop.f32.mrb[43].mxu0  ;;  %v1426_v45 = vadd.f32 %v1420_v40, %v2161_v54 }
 0xdaf   :  { %v1428_v46 = vsel %vm86_vm1, %v1426_v45, 0.0  ;;  %v1427_v47 = vadd.f32 %v1423_v43, %v2164_v56 }
 0xdb0   :  { %1429 = vadd.xlane.f32.xlu0 %v1428_v46 }
 0xdb1   :  { %v1431_v48 = vsel %vm86_vm1, %v1427_v47, 0.0 }
 0xdb2   :  { %1432 = vadd.xlane.f32.xlu1 %v1431_v48 }
 0xe3d   :  { %v1430_v49 = vpop.xlane.xlu0 %1429 }
 0xe3e   :  { %v1434_v50 = vmul.f32 0.03125, %v1430_v49 }
 0xe3f   :  { %v1433_v51 = vpop.xlane.xlu1 %1432 }
 0xe40   :  { %v1436_v52 = vsub.f32 %v1426_v45, %v1434_v50  ;;  %v1435_v53 = vmul.f32 0.03125, %v1433_v51 }
 0xe42   :  { %v1437_v55 = vsub.f32 %v1427_v47, %v1435_v53  ;;  %v1438_v57 = vmul.f32 %v1436_v52, %v1436_v52 }
 0xe44   :  { %v1440_v58 = vsel %vm86_vm1, %v1438_v57, 0.0  ;;  %v1439_v59 = vmul.f32 %v1437_v55, %v1437_v55 }
 0xe45   :  { %1441 = vadd.xlane.f32.xlu0 %v1440_v58 }
 0xe46   :  { %v1443_v54 = vsel %vm86_vm1, %v1439_v59, 0.0 }
 0xe47   :  { %1444 = vadd.xlane.f32.xlu1 %v1443_v54 }
 0xed2   :  { %v1442_v60 = vpop.xlane.xlu0 %1441 }
 0xed3   :  { %v1446_v56 = vmul.f32 0.03125, %v1442_v60 }
 0xed4   :  { %v1445_v61 = vpop.xlane.xlu1 %1444 }
 0xed5   :  { %v1448_v62 = vadd.f32 1e-05, %v1446_v56  ;;  %v1447_v63 = vmul.f32 0.03125, %v1445_v61 }
 0xed7   :  { %1795 = vrsqrt.f32 %v1448_v62  ;;  %v1449_v3 = vadd.f32 1e-05, %v1447_v63 }
 0xed9   :  { %1797 = vrsqrt.f32 %v1449_v3 }
 0xee1   :  { %v1796_v1 = vpop.eup %1795 }
 0xee2   :  { %v1452_v2 = vmul.f32 %v1796_v1, %v1436_v52 }
 0xee3   :  { %v1798_v5 = vpop.eup %1797 }
 0xee4   :  { %v1461_v8 = vmul.f32 %v1530_v4, %v1452_v2  ;;  %v1453_v9 = vmul.f32 %v1798_v5, %v1437_v55 }
 0xee6   :  { %v1462_v12 = vmul.f32 %v1530_v4, %v1453_v9  ;;  %v1470_v13 = vadd.f32 %v1531_v6, %v1461_v8 }
 0xee8   :  { %v1471_v15 = vadd.f32 %v1531_v6, %v1462_v12  ;;  %1472 = vst.msk [vmem:[#allocation5] sm:$0xff] %vm86_vm1, %v1470_v13 }
 0xeea   :  { %1473 = vst.msk [vmem:[#allocation5 + $0x8] sm:$0xff] %vm86_vm1, %v1471_v15 }
 0xeeb   :  { %1832 = shalt.err (!%p1829_p12)
}
 0xeec   :  { %s1833_s25 = scalar_lea.hbm %s2242_s13, 256 }
 0xeed   :  { %p1834_p13 = scmp.ne.s32.totalorder %s2242_s13, %s1833_s25  ;;  %p1837_p0 = scmp.lt.u32.totalorder %s1833_s25, %s2242_s13 }
 0xeef   :  { %p1839_p1 = pnand %p1837_p0, %p1834_p13 }
 0xef1   :  { %1842 = shalt.err (!%p1839_p1)
}
 0xef2   :  { %s1863_s4 = smov 128   ;;  %s1864_s1 = smov 8  }
 0xef3   :  { %1485 = dma.vmem_to_hbm [thread:$0]  %s1480_s5, 256, %s2242_s13, [#allocation4], %s1863_s4, %s1863_s4, %s1864_s1  }
 0xef4   :  { %1845 = dma.done.wait [#allocation4], 256  }
 0xef5   :  { %1846 = vsyncadd [#allocation4], 4294967040 }
 0xef6   :  { %1489 = vsyncpa [#allocation3], 1 }
 0xef7   :  { %1490 = vsyncpa [#allocation4], 1 }

// kernel: tpu_custom_call.1
= control target key start
LH: loop header
LB: loop body
LE: loop exit
PB: predicated region body
PF: predicated region fallthrough
CT: control target
= control target key end

     0   :  { %18 = vsyncpa [#allocation3], 0  ;;  %s2229_s0 = inlined_call_operand.vmem [shape: f32[16,32], index: 0, kind: input, shape index: {}]   ;;  %s2230_s1 = inlined_call_operand.vmem [shape: bf16[32,96], index: 1, kind: input, shape index: {}]   ;;  %s2231_s2 = inlined_call_operand.vmem [shape: f32[1,96], index: 2, kind: input, shape index: {}]   ;;  %s2232_s3 = inlined_call_operand.vmem [shape: bf16[32,32], index: 3, kind: input, shape index: {}]   ;;  %s2233_s4 = inlined_call_operand.vmem [shape: f32[1,32], index: 4, kind: input, shape index: {}]   ;;  %s2234_s5 = inlined_call_operand.hbm [shape: bf16[32,64], index: 5, kind: input, shape index: {}]   ;;  %s2235_s6 = inlined_call_operand.vmem [shape: f32[1,64], index: 6, kind: input, shape index: {}]   ;;  %s2236_s7 = inlined_call_operand.vmem [shape: bf16[64,32], index: 7, kind: input, shape index: {}]   ;;  %s2237_s8 = inlined_call_operand.vmem [shape: f32[1,32], index: 8, kind: input, shape index: {}]   ;;  %s2238_s9 = inlined_call_operand.vmem [shape: f32[1,32], index: 9, kind: input, shape index: {}]   ;;  %s2239_s10 = inlined_call_operand.vmem [shape: f32[1,32], index: 10, kind: input, shape index: {}]   ;;  %s2240_s11 = inlined_call_operand.vmem [shape: f32[1,32], index: 11, kind: input, shape index: {}]   ;;  %s2241_s12 = inlined_call_operand.vmem [shape: f32[1,32], index: 12, kind: input, shape index: {}]   ;;  %s2242_s13 = inlined_call_operand.hbm [shape: f32[16,32], index: 13, kind: output, shape index: {}]  }
   0x1   :  { %19 = vsyncpa [#allocation4], 0  ;;  %s1847_s25 = smov [#allocation2]   ;;  %s1799_s29 = scalar_lea.hbm %s2234_s5, 256 }
   0x2   :  { %s35_s26 = sshll.u32 %s1847_s25, 4  ;;  %p1800_p0 = scmp.ne.s32.totalorder %s2234_s5, %s1799_s29  ;;  %s36_s26 = int_to_ptr.vmem [resolvable:$true] %s35_s26 }
   0x3   :  { %p1803_p1 = scmp.lt.u32.totalorder %s1799_s29, %s2234_s5 }
   0x5   :  { %p1805_p2 = pnand %p1803_p1, %p1800_p0 }
   0x7   :  { %1808 = shalt.err (!%p1805_p2)
}
   0x8   :  { %s1809_s17 = scalar_lea.vmem %s36_s26, 256  ;;  %p1814_p4 = scmp.lt.s32.totalorder %s36_s26, %s36_s26 }
   0x9   :  { %p1810_p3 = scmp.ne.s32.totalorder %s36_s26, %s1809_s17  ;;  %p1815_p5 = scmp.lt.s32.totalorder %s1809_s17, %s1809_s17 }
   0xb   :  { %p1816_p6 = por %p1815_p5, %p1814_p4 }
   0xd   :  { %p1817_p7 = pnand %p1816_p6, %p1810_p3 }
   0xf   :  { %1820 = shalt.err (!%p1817_p7)
}
  0x10   :  { %s1848_s18 = smov 64   ;;  %s1849_s19 = smov 4  }
  0x11   :  { %41 = dma.hbm_to_vmem [thread:$0]  %s2234_s5, 256, %s36_s26, [#allocation3], %s1848_s18, %s1848_s18, %s1849_s19  }
  0x12   :  { %1843 = dma.done.wait [#allocation3], 256  }
  0x13   :  { %1844 = vsyncadd [#allocation3], 4294967040  ;;  %v1850_v0 = vmov 0.0   ;;  %vm1851_vm0 = vmmov 0   ;;  %v1751_v1 = vld [vmem:[%s2230_s1] sm:$0xff]   ;;  %v1752_v2 = vld [vmem:[%s2230_s1 + $0x8] sm:$0xff]  }
  0x14   :  { %1585 = vmatprep.subr.bf16.mxu1 %v1850_v0  ;;  %1589 = vmatprep.mubr.msk.bf16.mxu1 %vm1851_vm0, %v1850_v0  ;;  %v1964_v3 = vld [vmem:[%s2229_s0] sm:$0xff]  ;;  %v1969_v4 = vld [vmem:[%s2229_s0 + $0x8] sm:$0xff]  ;;  %vm86_vm1 = vcmask 261120   ;;  %s1852_s0 = smov 96   ;;  %s1853_s30 = smov 88   ;;  %vm139_vm2 = vcmask 64512  }
  0x15   :  { %1599 = vmatprep.subr.bf16.mxu0 %v1850_v0  ;;  %1601 = vmatprep.mubr.msk.bf16.mxu0 %vm1851_vm0, %v1850_v0  ;;  %v62_v5 = vpack.c.bf16 %v1969_v4, %v1964_v3  ;;  %v1491_v6 = vld [vmem:[%s2231_s2] ss:$0 sm:$0xff]  ;;  %s1854_s2 = smov 120   ;;  %vm259_vm3 = vcmask 1043456   ;;  %s1855_s14 = smov 56   ;;  %vm1381_vm4 = vcmask 523264  }
  0x16   :  { %1586 = vmatpush3.bf16.msra.mxu1 %v1751_v1  ;;  %s1856_s17 = smov 80   ;;  %s1858_s21 = smov 48  }
  0x17   :  { %1587 = vmatprep.subr.bf16.mxu1 %v1850_v0  ;;  %s1859_s22 = smov 72   ;;  %s1860_s23 = smov 104  }
  0x18   :  { %s1861_s25 = smov 40  }
  0x1a   :  { %1588 = vmatpush3.bf16.msra.mxu1 %v1752_v2 }
  0x1b   :  { %1593 = vmatprep.subr.bf16.mxu1 %v1850_v0 }
  0x1d   :  { %1590 = vmatmul.mubr.msk.bf16.vlgmr.msra.gmra.mrb[0].mxu1 %vm86_vm1, %v62_v5 }
  0x1e   :  { %1595 = vmatprep.mubr.msk.bf16.mxu1 %vm1851_vm0, %v1850_v0 }
  0xf0   :  { %v124_v7 = vpop.f32.mrb[0].mxu1 }
  0xf1   :  { %v125_v8 = vadd.f32 %v1491_v6, %v124_v7  ;;  %v1591_v9 = vpop.f32.mrb[1].mxu1 }
  0xf2   :  { %v127_v10 = vpop.f32.mrb[2].mxu1 }
  0xf3   :  { %v1981_v11 = vpack.c.bf16 %v125_v8, %v125_v8  ;;  %v128_v12 = vadd.f32 %v1491_v6, %v127_v10  ;;  %v1592_v13 = vpop.f32.mrb[3].mxu1 }
  0xf5   :  { %137 = vrot.lane.b32.xlu0 %v1981_v11, %s1852_s0  ;;  %v1984_v14 = vpack.c.bf16 %v128_v12, %v128_v12 }
  0xf9   :  { %186 = vrot.lane.b32.xlu0 %v1984_v14, %s1852_s0 }
  0xfd   :  { %254 = vrot.lane.b32.xlu0 %v1981_v11, %s1848_s18 }
 0x101   :  { %359 = vrot.lane.b32.xlu0 %v1981_v11, %s1853_s30 }
 0x105   :  { %409 = vrot.lane.b32.xlu0 %v1984_v14, %s1853_s30 }
 0x109   :  { %357 = vrot.lane.b32.xlu0 %v1981_v11, %s1854_s2 }
 0x10d   :  { %407 = vrot.lane.b32.xlu0 %v1984_v14, %s1854_s2 }
 0x167   :  { %v138_v15 = vpop.permute.xlu0 %137 }
 0x168   :  { %v144_v16 = vsel %vm139_vm2, %v138_v15, 0 }
 0x169   :  { %1594 = vmatpush3.bf16.xpose.msra.mxu1 %v144_v16 }
 0x16a   :  { %1605 = vmatprep.subr.bf16.mxu1 %v1850_v0 }
 0x16b   :  { %v187_v17 = vpop.permute.xlu0 %186 }
 0x16c   :  { %v192_v18 = vsel %vm139_vm2, %v187_v17, 0 }
 0x16d   :  { %1600 = vmatpush3.bf16.xpose.msra.mxu0 %v192_v18 }
 0x16e   :  { %1611 = vmatprep.subr.bf16.mxu0 %v1850_v0 }
 0x16f   :  { %v255_v19 = vpop.permute.xlu0 %254 }
 0x170   :  { %v261_v20 = vsel %vm259_vm3, %v255_v19, 0  ;;  %1596 = vmatmul.mubr.msk.bf16.vlgmr.msra.gmra.mrb[4].mxu1 %vm139_vm2, %v1981_v11 }
 0x171   :  { %1606 = vmatpush3.bf16.msra.mxu1 %v261_v20  ;;  %1607 = vmatprep.mubr.msk.bf16.mxu1 %vm1851_vm0, %v1850_v0 }
 0x172   :  { %1617 = vmatprep.subr.bf16.mxu1 %v1850_v0 }
 0x173   :  { %v360_v39 = vpop.permute.xlu0 %359 }
 0x174   :  { %1602 = vmatmul.mubr.msk.bf16.vlgmr.msra.gmra.mrb[0].mxu0 %vm139_vm2, %v1984_v14  ;;  %v365_v43 = vsel %vm139_vm2, %v360_v39, 0 }
 0x175   :  { %1613 = vmatprep.mubr.msk.bf16.mxu0 %vm1851_vm0, %v1850_v0 }
 0x177   :  { %v410_v42 = vpop.permute.xlu0 %409 }
 0x178   :  { %v415_v46 = vsel %vm139_vm2, %v410_v42, 0 }
 0x17b   :  { %v358_v47 = vpop.permute.xlu0 %357 }
 0x17f   :  { %v408_v48 = vpop.permute.xlu0 %407 }
 0x243   :  { %v180_v21 = vpop.f32.mrb[4].mxu1 }
 0x244   :  { %v1597_v22 = vpop.f32.mrb[5].mxu1  ;;  %v234_v23 = vsel %vm139_vm2, %v180_v21, -inf }
 0x245   :  { %235 = vmax.xlane.f32.xlu1 %v234_v23  ;;  %v183_v24 = vpop.f32.mrb[6].mxu1  ;;  %v356_v23 = vld [vmem:[%s2232_s3] sm:$0xf] }
 0x246   :  { %v1598_v25 = vpop.f32.mrb[7].mxu1 }
 0x247   :  { %v228_v26 = vpop.f32.mrb[0].mxu0 }
 0x248   :  { %v1603_v27 = vpop.f32.mrb[1].mxu0  ;;  %v237_v28 = vsel %vm139_vm2, %v228_v26, -inf }
 0x249   :  { %v231_v29 = vpop.f32.mrb[2].mxu0  ;;  %238 = vmax.xlane.f32.xlu1 %v237_v28  ;;  %v630_v27 = vsel %vm259_vm3, %v356_v23, 0 }
 0x24a   :  { %v1604_v30 = vpop.f32.mrb[3].mxu0 }
 0x25a   :  { %303 = vrot.lane.b32.xlu1 %v1984_v14, %s1848_s18  ;;  %s1857_s18 = smov 112  }
 0x2d2   :  { %v236_v31 = vpop.xlane.xlu1 %235 }
 0x2d3   :  { %v240_v32 = vsub.f32 %v180_v21, %v236_v31 }
 0x2d5   :  { %v242_v33 = vmul.f32 1.442695, %v240_v32 }
 0x2d6   :  { %v239_v34 = vpop.xlane.xlu1 %238 }
 0x2d7   :  { %1759 = vpow2.f32 %v242_v33  ;;  %v241_v35 = vsub.f32 %v228_v26, %v239_v34 }
 0x2d9   :  { %v244_v36 = vmul.f32 1.442695, %v241_v35  ;;  %v578_v35 = vld [vmem:[%s2232_s3 + $0x4] sm:$0xf] }
 0x2da   :  { %v304_v37 = vpop.permute.xlu1 %303 }
 0x2db   :  { %1761 = vpow2.f32 %v244_v36  ;;  %v309_v38 = vsel %vm259_vm3, %v304_v37, 0  ;;  %v583_v36 = vsel %vm259_vm3, %v578_v35, 0 }
 0x2dc   :  { %1612 = vmatpush3.bf16.msra.mxu0 %v309_v38 }
 0x2dd   :  { %1623 = vmatprep.subr.bf16.mxu0 %v1850_v0 }
 0x2e1   :  { %v1760_v40 = vpop.eup %1759 }
 0x2e2   :  { %v252_v41 = vpack.c.bf16 %v1760_v40, %v1760_v40  ;;  %v246_v6 = vsel %vm139_vm2, %v1760_v40, 0.0 }
 0x2e4   :  { %1608 = vmatmul.mubr.msk.bf16.vlgmr.msra.gmra.mrb[8].mxu1 %vm139_vm2, %v252_v41 }
 0x2e5   :  { %v1762_v44 = vpop.eup %1761  ;;  %1618 = vmatpush3.bf16.xpose.msra.mxu1 %v365_v43  ;;  %1619 = vmatprep.mubr.msk.bf16.mxu1 %vm1851_vm0, %v1850_v0 }
 0x2e6   :  { %v253_v45 = vpack.c.bf16 %v1762_v44, %v1762_v44  ;;  %1629 = vmatprep.subr.bf16.mxu1 %v1850_v0  ;;  %v249_v7 = vsel %vm139_vm2, %v1762_v44, 0.0 }
 0x2e8   :  { %1614 = vmatmul.mubr.msk.bf16.vlgmr.msra.gmra.mrb[4].mxu0 %vm139_vm2, %v253_v45 }
 0x2e9   :  { %1624 = vmatpush3.bf16.xpose.msra.mxu0 %v415_v46  ;;  %1625 = vmatprep.mubr.msk.bf16.mxu0 %vm1851_vm0, %v1850_v0 }
 0x2ea   :  { %1635 = vmatprep.subr.bf16.mxu0 %v1850_v0 }
 0x2ec   :  { %1620 = vmatmul.mubr.msk.bf16.vlgmr.msra.gmra.mrb[12].mxu1 %vm139_vm2, %v358_v47 }
 0x2ed   :  { %1631 = vmatprep.mubr.msk.bf16.mxu1 %vm1851_vm0, %v1850_v0 }
 0x2f0   :  { %1626 = vmatmul.mubr.msk.bf16.vlgmr.msra.gmra.mrb[8].mxu0 %vm139_vm2, %v408_v48 }
 0x2f1   :  { %1637 = vmatprep.mubr.msk.bf16.mxu0 %vm1851_vm0, %v1850_v0 }
 0x3b7   :  { %v2029_v49 = vpop.f32.mrb[8].mxu1 }
 0x3b8   :  { %v1609_v50 = vpop.f32.mrb[9].mxu1 }
 0x3b9   :  { %v300_v51 = vpop.f32.mrb[10].mxu1 }
 0x3ba   :  { %v1610_v52 = vpop.f32.mrb[11].mxu1 }
 0x3bb   :  { %v2031_v53 = vpop.f32.mrb[4].mxu0 }
 0x3bc   :  { %v1615_v54 = vpop.f32.mrb[5].mxu0 }
 0x3bd   :  { %v348_v55 = vpop.f32.mrb[6].mxu0 }
 0x3be   :  { %v1616_v56 = vpop.f32.mrb[7].mxu0 }
 0x3bf   :  { %v401_v57 = vpop.f32.mrb[12].mxu1 }
 0x3c0   :  { %v1621_v58 = vpop.f32.mrb[13].mxu1  ;;  %v457_v59 = vsel %vm139_vm2, %v401_v57, -inf }
 0x3c1   :  { %458 = vmax.xlane.f32.xlu1 %v457_v59  ;;  %v404_v60 = vpop.f32.mrb[14].mxu1 }
 0x3c2   :  { %v1622_v61 = vpop.f32.mrb[15].mxu1 }
 0x3c3   :  { %v451_v62 = vpop.f32.mrb[8].mxu0 }
 0x3c4   :  { %v1627_v63 = vpop.f32.mrb[9].mxu0  ;;  %v460_v1 = vsel %vm139_vm2, %v451_v62, -inf }
 0x3c5   :  { %461 = vmax.xlane.f32.xlu0 %v460_v1  ;;  %v454_v2 = vpop.f32.mrb[10].mxu0 }
 0x3c6   :  { %v1628_v5 = vpop.f32.mrb[11].mxu0 }
 0x3d2   :  { %525 = vrot.lane.b32.xlu1 %v1984_v14, %s1855_s14 }
 0x3db   :  { %477 = vrot.lane.b32.xlu0 %v1981_v11, %s1855_s14 }
 0x3f6   :  { %247 = vadd.xlane.f32.xlu1 %v246_v6 }
 0x3fa   :  { %250 = vadd.xlane.f32.xlu0 %v249_v7 }
 0x44e   :  { %v459_v8 = vpop.xlane.xlu1 %458 }
 0x44f   :  { %v463_v9 = vsub.f32 %v401_v57, %v459_v8 }
 0x451   :  { %v465_v10 = vmul.f32 1.442695, %v463_v9 }
 0x452   :  { %v462_v12 = vpop.xlane.xlu0 %461  ;;  %v526_v13 = vpop.permute.xlu1 %525 }
 0x453   :  { %1763 = vpow2.f32 %v465_v10  ;;  %v464_v15 = vsub.f32 %v451_v62, %v462_v12  ;;  %v531_v16 = vsel %vm259_vm3, %v526_v13, 0 }
 0x454   :  { %1636 = vmatpush3.bf16.msra.mxu0 %v531_v16 }
 0x455   :  { %v467_v17 = vmul.f32 1.442695, %v464_v15  ;;  %1647 = vmatprep.subr.bf16.mxu0 %v1850_v0 }
 0x456   :  { %v478_v18 = vpop.permute.xlu0 %477 }
 0x457   :  { %1765 = vpow2.f32 %v467_v17  ;;  %v483_v19 = vsel %vm259_vm3, %v478_v18, 0 }
 0x458   :  { %1630 = vmatpush3.bf16.msra.mxu1 %v483_v19 }
 0x459   :  { %1641 = vmatprep.subr.bf16.mxu1 %v1850_v0 }
 0x45d   :  { %v1764_v20 = vpop.eup %1763 }
 0x45e   :  { %v469_v21 = vsel %vm139_vm2, %v1764_v20, 0.0  ;;  %v475_v22 = vpack.c.bf16 %v1764_v20, %v1764_v20 }
 0x45f   :  { %470 = vadd.xlane.f32.xlu0 %v469_v21 }
 0x460   :  { %1632 = vmatmul.mubr.msk.bf16.vlgmr.msra.gmra.mrb[16].mxu1 %vm139_vm2, %v475_v22 }
 0x461   :  { %v1766_v24 = vpop.eup %1765  ;;  %1643 = vmatprep.mubr.msk.bf16.mxu1 %vm1851_vm0, %v1850_v0  ;;  %1642 = vmatpush3.bf16.msra.mxu1 %v583_v36 }
 0x462   :  { %v472_v25 = vsel %vm139_vm2, %v1766_v24, 0.0  ;;  %v476_v26 = vpack.c.bf16 %v1766_v24, %v1766_v24  ;;  %1653 = vmatprep.subr.bf16.mxu1 %v1850_v0 }
 0x463   :  { %473 = vadd.xlane.f32.xlu1 %v472_v25 }
 0x464   :  { %1638 = vmatmul.mubr.msk.bf16.vlgmr.msra.gmra.mrb[12].mxu0 %vm139_vm2, %v476_v26 }
 0x465   :  { %1648 = vmatpush3.bf16.msra.mxu0 %v630_v27  ;;  %1649 = vmatprep.mubr.msk.bf16.mxu0 %vm1851_vm0, %v1850_v0 }
 0x466   :  { %1659 = vmatprep.subr.bf16.mxu0 %v1850_v0 }
 0x474   :  { %725 = vrot.lane.b32.xlu1 %v1984_v14, %s1856_s17 }
 0x475   :  { %675 = vrot.lane.b32.xlu0 %v1981_v11, %s1856_s17 }
 0x478   :  { %673 = vrot.lane.b32.xlu1 %v1981_v11, %s1857_s18 }
 0x479   :  { %723 = vrot.lane.b32.xlu0 %v1984_v14, %s1857_s18 }
 0x483   :  { %v248_v28 = vpop.xlane.xlu1 %247 }
 0x484   :  { %1767 = vrcp.f32 %v248_v28 }
 0x487   :  { %v251_v29 = vpop.xlane.xlu0 %250 }
 0x488   :  { %1769 = vrcp.f32 %v251_v29 }
 0x48e   :  { %v1768_v30 = vpop.eup %1767 }
 0x48f   :  { %v353_v32 = vmul.f32 %v1768_v30, %v2029_v49 }
 0x492   :  { %v1770_v31 = vpop.eup %1769 }
 0x493   :  { %v354_v33 = vmul.f32 %v1770_v31, %v2031_v53 }
 0x495   :  { %v355_v34 = vpack.c.bf16 %v354_v33, %v353_v32 }
 0x497   :  { %1650 = vmatmul.mubr.msk.bf16.vlgmr.msra.gmra.mrb[16].mxu0 %vm139_vm2, %v355_v34 }
 0x498   :  { %1661 = vmatprep.mubr.msk.bf16.mxu0 %vm1851_vm0, %v1850_v0 }
 0x4ec   :  { %v471_v37 = vpop.xlane.xlu0 %470 }
 0x4ed   :  { %1771 = vrcp.f32 %v471_v37 }
 0x4f0   :  { %v474_v38 = vpop.xlane.xlu1 %473  ;;  %v676_v41 = vpop.permute.xlu0 %675 }
 0x4f1   :  { %1773 = vrcp.f32 %v474_v38  ;;  %v681_v56 = vsel %vm139_vm2, %v676_v41, 0  ;;  %v894_v38 = vld [vmem:[%s2232_s3 + $0x8] sm:$0xf] }
 0x4f4   :  { %v726_v39 = vpop.permute.xlu1 %725  ;;  %v724_v42 = vpop.permute.xlu0 %723 }
 0x4f5   :  { %v731_v40 = vsel %vm139_vm2, %v726_v39, 0  ;;  %v899_v39 = vsel %vm259_vm3, %v894_v38, 0 }
 0x4f6   :  { %1660 = vmatpush3.bf16.xpose.msra.mxu0 %v731_v40 }
 0x4f7   :  { %1671 = vmatprep.subr.bf16.mxu0 %v1850_v0  ;;  %v1772_v46 = vpop.eup %1771 }
 0x4f8   :  { %v674_v57 = vpop.permute.xlu1 %673 }
 0x4fb   :  { %v1774_v48 = vpop.eup %1773 }
 0x4fd   :  { %1662 = vmatmul.mubr.msk.bf16.vlgmr.msra.gmra.mrb[20].mxu0 %vm139_vm2, %v724_v42 }
 0x4fe   :  { %1673 = vmatprep.mubr.msk.bf16.mxu0 %vm1851_vm0, %v1850_v0 }
 0x533   :  { %v519_v43 = vpop.f32.mrb[16].mxu1 }
 0x534   :  { %v1633_v44 = vpop.f32.mrb[17].mxu1  ;;  %v575_v50 = vmul.f32 %v1772_v46, %v519_v43 }
 0x535   :  { %v522_v45 = vpop.f32.mrb[18].mxu1 }
 0x536   :  { %v1634_v47 = vpop.f32.mrb[19].mxu1 }
 0x537   :  { %v567_v49 = vpop.f32.mrb[12].mxu0 }
 0x538   :  { %v576_v51 = vmul.f32 %v1774_v48, %v567_v49  ;;  %v1639_v52 = vpop.f32.mrb[13].mxu0 }
 0x539   :  { %v570_v53 = vpop.f32.mrb[14].mxu0 }
 0x53a   :  { %v577_v54 = vpack.c.bf16 %v576_v51, %v575_v50  ;;  %v1640_v55 = vpop.f32.mrb[15].mxu0 }
 0x53c   :  { %1644 = vmatmul.mubr.msk.bf16.vlgmr.msra.gmra.mrb[20].mxu1 %vm139_vm2, %v577_v54 }
 0x53d   :  { %1654 = vmatpush3.bf16.xpose.msra.mxu1 %v681_v56  ;;  %1655 = vmatprep.mubr.msk.bf16.mxu1 %vm1851_vm0, %v1850_v0 }
 0x53e   :  { %1665 = vmatprep.subr.bf16.mxu1 %v1850_v0 }
 0x544   :  { %1656 = vmatmul.mubr.msk.bf16.vlgmr.msra.gmra.mrb[24].mxu1 %vm139_vm2, %v674_v57 }
 0x545   :  { %1667 = vmatprep.mubr.msk.bf16.mxu1 %vm1851_vm0, %v1850_v0 }
 0x56a   :  { %v666_v58 = vpop.f32.mrb[16].mxu0 }
 0x56b   :  { %v1651_v59 = vpop.f32.mrb[17].mxu0 }
 0x56c   :  { %v669_v60 = vpop.f32.mrb[18].mxu0 }
 0x56d   :  { %v1652_v61 = vpop.f32.mrb[19].mxu0 }
 0x5d0   :  { %v767_v62 = vpop.f32.mrb[20].mxu0 }
 0x5d1   :  { %v1663_v63 = vpop.f32.mrb[21].mxu0  ;;  %v776_v1 = vsel %vm139_vm2, %v767_v62, -inf }
 0x5d2   :  { %777 = vmax.xlane.f32.xlu0 %v776_v1  ;;  %v770_v2 = vpop.f32.mrb[22].mxu0 }
 0x5d3   :  { %v1664_v5 = vpop.f32.mrb[23].mxu0 }
 0x5e8   :  { %793 = vrot.lane.b32.xlu0 %v1981_v11, %s1858_s21 }
 0x60f   :  { %v619_v6 = vpop.f32.mrb[20].mxu1 }
 0x610   :  { %v2085_v7 = vadd.f32 %v666_v58, %v619_v6  ;;  %v1645_v8 = vpop.f32.mrb[21].mxu1 }
 0x611   :  { %v622_v9 = vpop.f32.mrb[22].mxu1 }
 0x612   :  { %v2087_v10 = vadd.f32 %v669_v60, %v622_v9  ;;  %v1646_v12 = vpop.f32.mrb[23].mxu1 }
 0x617   :  { %v717_v13 = vpop.f32.mrb[24].mxu1 }
 0x618   :  { %v1657_v15 = vpop.f32.mrb[25].mxu1  ;;  %v773_v16 = vsel %vm139_vm2, %v717_v13, -inf }
 0x619   :  { %774 = vmax.xlane.f32.xlu1 %v773_v16  ;;  %v720_v17 = vpop.f32.mrb[26].mxu1 }
 0x61a   :  { %v1658_v18 = vpop.f32.mrb[27].mxu1 }
 0x62a   :  { %841 = vrot.lane.b32.xlu1 %v1984_v14, %s1858_s21 }
 0x65f   :  { %v778_v19 = vpop.xlane.xlu0 %777 }
 0x660   :  { %v780_v20 = vsub.f32 %v767_v62, %v778_v19 }
 0x662   :  { %v783_v21 = vmul.f32 1.442695, %v780_v20 }
 0x663   :  { %v794_v22 = vpop.permute.xlu0 %793 }
 0x664   :  { %1775 = vpow2.f32 %v783_v21  ;;  %v799_v23 = vsel %vm259_vm3, %v794_v22, 0 }
 0x665   :  { %1666 = vmatpush3.bf16.msra.mxu1 %v799_v23 }
 0x666   :  { %1677 = vmatprep.subr.bf16.mxu1 %v1850_v0 }
 0x66e   :  { %v1776_v24 = vpop.eup %1775 }
 0x66f   :  { %v788_v25 = vsel %vm139_vm2, %v1776_v24, 0.0  ;;  %v792_v31 = vpack.c.bf16 %v1776_v24, %v1776_v24 }
 0x670   :  { %789 = vadd.xlane.f32.xlu0 %v788_v25 }
 0x686   :  { %946 = vrot.lane.b32.xlu0 %v1981_v11, %s1859_s22 }
 0x68a   :  { %994 = vrot.lane.b32.xlu0 %v1984_v14, %s1860_s23 }
 0x6a6   :  { %v775_v26 = vpop.xlane.xlu1 %774 }
 0x6a7   :  { %v779_v27 = vsub.f32 %v717_v13, %v775_v26 }
 0x6a9   :  { %v781_v28 = vmul.f32 1.442695, %v779_v27 }
 0x6aa   :  { %v842_v29 = vpop.permute.xlu1 %841 }
 0x6ab   :  { %1777 = vpow2.f32 %v781_v28  ;;  %v847_v30 = vsel %vm259_vm3, %v842_v29, 0  ;;  %v1165_v29 = vld [vmem:[%s2232_s3 + $0xc] sm:$0xf] }
 0x6ac   :  { %1672 = vmatpush3.bf16.msra.mxu0 %v847_v30  ;;  %v1170_v30 = vsel %vm259_vm3, %v1165_v29, 0  ;;  %v1520_v29 = vld [vmem:[%s2235_s6] ss:$0 sm:$0xff] }
 0x6ad   :  { %1683 = vmatprep.subr.bf16.mxu0 %v1850_v0 }
 0x6af   :  { %1674 = vmatmul.mubr.msk.bf16.vlgmr.msra.gmra.mrb[24].mxu0 %vm139_vm2, %v792_v31 }
 0x6b0   :  { %1685 = vmatprep.mubr.msk.bf16.mxu0 %vm1851_vm0, %v1850_v0 }
 0x6b5   :  { %v1778_v32 = vpop.eup %1777 }
 0x6b6   :  { %v785_v33 = vsel %vm139_vm2, %v1778_v32, 0.0  ;;  %v791_v34 = vpack.c.bf16 %v1778_v32, %v1778_v32 }
 0x6b7   :  { %786 = vadd.xlane.f32.xlu1 %v785_v33 }
 0x6b8   :  { %1668 = vmatmul.mubr.msk.bf16.vlgmr.msra.gmra.mrb[28].mxu1 %vm139_vm2, %v791_v34 }
 0x6b9   :  { %1679 = vmatprep.mubr.msk.bf16.mxu1 %vm1851_vm0, %v1850_v0  ;;  %1678 = vmatpush3.bf16.msra.mxu1 %v899_v39 }
 0x6ba   :  { %1689 = vmatprep.subr.bf16.mxu1 %v1850_v0 }
 0x6c8   :  { %996 = vrot.lane.b32.xlu1 %v1984_v14, %s1859_s22 }
 0x6cc   :  { %944 = vrot.lane.b32.xlu1 %v1981_v11, %s1860_s23  ;;  %s1862_s23 = smov [#allocation5]  }
 0x6cd   :  { %s1479_s5 = sshll.u32 %s1862_s23, 4  ;;  %s1480_s5 = int_to_ptr.vmem [resolvable:$true] %s1479_s5 }
 0x6ce   :  { %s1821_s24 = scalar_lea.vmem %s1480_s5, 256  ;;  %p1826_p9 = scmp.lt.s32.totalorder %s1480_s5, %s1480_s5 }
 0x6cf   :  { %p1822_p8 = scmp.ne.s32.totalorder %s1480_s5, %s1821_s24  ;;  %p1827_p10 = scmp.lt.s32.totalorder %s1821_s24, %s1821_s24 }
 0x6d1   :  { %p1828_p11 = por %p1827_p10, %p1826_p9 }
 0x6d3   :  { %p1829_p12 = pnand %p1828_p11, %p1822_p8 }
 0x6fd   :  { %v790_v35 = vpop.xlane.xlu0 %789 }
 0x6fe   :  { %1779 = vrcp.f32 %v790_v35 }
 0x701   :  { %v947_v36 = vpop.permute.xlu0 %946 }
 0x702   :  { %v952_v37 = vsel %vm139_vm2, %v947_v36, 0 }
 0x703   :  { %1684 = vmatpush3.bf16.xpose.msra.mxu0 %v952_v37 }
 0x704   :  { %1695 = vmatprep.subr.bf16.mxu0 %v1850_v0 }
 0x705   :  { %v995_v57 = vpop.permute.xlu0 %994 }
 0x708   :  { %v1780_v43 = vpop.eup %1779 }
 0x744   :  { %v787_v40 = vpop.xlane.xlu1 %786 }
 0x745   :  { %1781 = vrcp.f32 %v787_v40 }
 0x748   :  { %v997_v41 = vpop.permute.xlu1 %996 }
 0x749   :  { %v1002_v56 = vsel %vm139_vm2, %v997_v41, 0 }
 0x74c   :  { %v945_v42 = vpop.permute.xlu1 %944 }
 0x74d   :  { %1686 = vmatmul.mubr.msk.bf16.vlgmr.msra.gmra.mrb[28].mxu0 %vm139_vm2, %v945_v42 }
 0x74e   :  { %1697 = vmatprep.mubr.msk.bf16.mxu0 %vm1851_vm0, %v1850_v0 }
 0x74f   :  { %v1782_v49 = vpop.eup %1781 }
 0x782   :  { %v883_v44 = vpop.f32.mrb[24].mxu0 }
 0x783   :  { %v892_v45 = vmul.f32 %v1780_v43, %v883_v44  ;;  %v1675_v46 = vpop.f32.mrb[25].mxu0 }
 0x784   :  { %v886_v47 = vpop.f32.mrb[26].mxu0 }
 0x785   :  { %v1676_v48 = vpop.f32.mrb[27].mxu0  ;;  %v1517_v47 = vld [vmem:[%s2233_s4] ss:$0 sm:$0xff] }
 0x78b   :  { %v835_v50 = vpop.f32.mrb[28].mxu1 }
 0x78c   :  { %v891_v51 = vmul.f32 %v1782_v49, %v835_v50  ;;  %v1669_v52 = vpop.f32.mrb[29].mxu1 }
 0x78d   :  { %v838_v53 = vpop.f32.mrb[30].mxu1 }
 0x78e   :  { %v893_v54 = vpack.c.bf16 %v892_v45, %v891_v51  ;;  %v1670_v55 = vpop.f32.mrb[31].mxu1 }
 0x790   :  { %1680 = vmatmul.mubr.msk.bf16.vlgmr.msra.gmra.mrb[32].mxu1 %vm139_vm2, %v893_v54 }
 0x791   :  { %1690 = vmatpush3.bf16.xpose.msra.mxu1 %v1002_v56  ;;  %1691 = vmatprep.mubr.msk.bf16.mxu1 %vm1851_vm0, %v1850_v0 }
 0x792   :  { %1701 = vmatprep.subr.bf16.mxu1 %v1850_v0 }
 0x798   :  { %1692 = vmatmul.mubr.msk.bf16.vlgmr.msra.gmra.mrb[36].mxu1 %vm139_vm2, %v995_v57 }
 0x799   :  { %1703 = vmatprep.mubr.msk.bf16.mxu1 %vm1851_vm0, %v1850_v0 }
 0x820   :  { %v988_v58 = vpop.f32.mrb[28].mxu0 }
 0x821   :  { %v1687_v59 = vpop.f32.mrb[29].mxu0  ;;  %v1044_v60 = vsel %vm139_vm2, %v988_v58, -inf }
 0x822   :  { %1045 = vmax.xlane.f32.xlu1 %v1044_v60  ;;  %v991_v61 = vpop.f32.mrb[30].mxu0 }
 0x823   :  { %v1688_v62 = vpop.f32.mrb[31].mxu0 }
 0x833   :  { %1112 = vrot.lane.b32.xlu1 %v1984_v14, %s1861_s25 }
 0x863   :  { %v935_v63 = vpop.f32.mrb[32].mxu1 }
 0x864   :  { %v2128_v1 = vadd.f32 %v935_v63, %v2085_v7  ;;  %v1681_v2 = vpop.f32.mrb[33].mxu1 }
 0x865   :  { %v938_v5 = vpop.f32.mrb[34].mxu1 }
 0x866   :  { %v2131_v6 = vadd.f32 %v938_v5, %v2087_v10  ;;  %v1682_v8 = vpop.f32.mrb[35].mxu1 }
 0x867   :  { %v1754_v8 = vld [vmem:[#allocation2 + $0x8] sm:$0xff]  }
 0x86b   :  { %v1038_v9 = vpop.f32.mrb[36].mxu1 }
 0x86c   :  { %v1693_v12 = vpop.f32.mrb[37].mxu1  ;;  %v1047_v13 = vsel %vm139_vm2, %v1038_v9, -inf }
 0x86d   :  { %1048 = vmax.xlane.f32.xlu0 %v1047_v13  ;;  %v1041_v15 = vpop.f32.mrb[38].mxu1  ;;  %v1756_v12 = vld [vmem:[%s2236_s7 + $0x8] sm:$0xff]  }
 0x86e   :  { %v1694_v16 = vpop.f32.mrb[39].mxu1 }
 0x883   :  { %1064 = vrot.lane.b32.xlu0 %v1981_v11, %s1861_s25 }
 0x8af   :  { %v1046_v14 = vpop.xlane.xlu1 %1045 }
 0x8b0   :  { %v1050_v17 = vsub.f32 %v988_v58, %v1046_v14 }
 0x8b2   :  { %v1052_v18 = vmul.f32 1.442695, %v1050_v17 }
 0x8b3   :  { %v1113_v7 = vpop.permute.xlu1 %1112 }
 0x8b4   :  { %1783 = vpow2.f32 %v1052_v18  ;;  %v1118_v19 = vsel %vm259_vm3, %v1113_v7, 0 }
 0x8b5   :  { %1702 = vmatpush3.bf16.msra.mxu1 %v1118_v19  ;;  %v1518_v19 = vld [vmem:[%s2238_s9] ss:$0 sm:$0xff] }
 0x8b6   :  { %1713 = vmatprep.subr.bf16.mxu1 %v1850_v0 }
 0x8be   :  { %v1784_v10 = vpop.eup %1783 }
 0x8bf   :  { %v1056_v20 = vsel %vm139_vm2, %v1784_v10, 0.0  ;;  %v1062_v25 = vpack.c.bf16 %v1784_v10, %v1784_v10 }
 0x8c0   :  { %1057 = vadd.xlane.f32.xlu1 %v1056_v20 }
 0x8fa   :  { %v1049_v21 = vpop.xlane.xlu0 %1048 }
 0x8fb   :  { %v1051_v22 = vsub.f32 %v1038_v9, %v1049_v21  ;;  %v1755_v9 = vld [vmem:[%s2236_s7] sm:$0xff]  }
 0x8fd   :  { %v1054_v23 = vmul.f32 1.442695, %v1051_v22 }
 0x8fe   :  { %v1065_v24 = vpop.permute.xlu0 %1064 }
 0x8ff   :  { %1785 = vpow2.f32 %v1054_v23  ;;  %v1070_v11 = vsel %vm259_vm3, %v1065_v24, 0  ;;  %v1519_v23 = vld [vmem:[%s2239_s10] ss:$0 sm:$0xff] }
 0x900   :  { %1696 = vmatpush3.bf16.msra.mxu0 %v1070_v11 }
 0x901   :  { %1707 = vmatprep.subr.bf16.mxu0 %v1850_v0 }
 0x903   :  { %1698 = vmatmul.mubr.msk.bf16.vlgmr.msra.gmra.mrb[32].mxu0 %vm139_vm2, %v1062_v25 }
 0x904   :  { %1709 = vmatprep.mubr.msk.bf16.mxu0 %vm1851_vm0, %v1850_v0  ;;  %1708 = vmatpush3.bf16.msra.mxu0 %v1170_v30 }
 0x905   :  { %1721 = vmatprep.subr.bf16.mxu0 %v1850_v0 }
 0x909   :  { %v1786_v26 = vpop.eup %1785 }
 0x90a   :  { %v1059_v27 = vsel %vm139_vm2, %v1786_v26, 0.0  ;;  %v1063_v28 = vpack.c.bf16 %v1786_v26, %v1786_v26 }
 0x90b   :  { %1060 = vadd.xlane.f32.xlu0 %v1059_v27  ;;  %v1757_v27 = vld [vmem:[%s2236_s7 + $0x10] sm:$0xff]  }
 0x90c   :  { %1704 = vmatmul.mubr.msk.bf16.vlgmr.msra.gmra.mrb[40].mxu1 %vm139_vm2, %v1063_v28  ;;  %v1758_v28 = vld [vmem:[%s2236_s7 + $0x18] sm:$0xff]  }
 0x90d   :  { %1717 = vmatprep.mubr.msk.bf16.mxu1 %vm1851_vm0, %v1850_v0 }
 0x94d   :  { %v1058_v31 = vpop.xlane.xlu1 %1057 }
 0x94e   :  { %1787 = vrcp.f32 %v1058_v31 }
 0x958   :  { %v1788_v37 = vpop.eup %1787 }
 0x998   :  { %v1061_v32 = vpop.xlane.xlu0 %1060 }
 0x999   :  { %1789 = vrcp.f32 %v1061_v32 }
 0x9a3   :  { %v1790_v38 = vpop.eup %1789 }
 0x9d6   :  { %v1106_v33 = vpop.f32.mrb[32].mxu0 }
 0x9d7   :  { %v1699_v34 = vpop.f32.mrb[33].mxu0  ;;  %v1162_v40 = vmul.f32 %v1788_v37, %v1106_v33 }
 0x9d8   :  { %v1109_v35 = vpop.f32.mrb[34].mxu0 }
 0x9d9   :  { %v1700_v36 = vpop.f32.mrb[35].mxu0 }
 0x9df   :  { %v1154_v39 = vpop.f32.mrb[40].mxu1 }
 0x9e0   :  { %v1163_v41 = vmul.f32 %v1790_v38, %v1154_v39  ;;  %v1705_v42 = vpop.f32.mrb[41].mxu1 }
 0x9e1   :  { %v1157_v43 = vpop.f32.mrb[42].mxu1 }
 0x9e2   :  { %v1164_v44 = vpack.c.bf16 %v1163_v41, %v1162_v40  ;;  %v1706_v45 = vpop.f32.mrb[43].mxu1 }
 0x9e4   :  { %1710 = vmatmul.mubr.msk.bf16.vlgmr.msra.gmra.mrb[36].mxu0 %vm139_vm2, %v1164_v44 }
 0x9e5   :  { %1729 = vmatprep.mubr.msk.bf16.mxu0 %vm1851_vm0, %v1850_v0  ;;  %1722 = vmatpush3.bf16.msra.mxu0 %v1755_v9 }
 0x9e6   :  { %1723 = vmatprep.subr.bf16.mxu0 %v1850_v0 }
 0x9e9   :  { %1724 = vmatpush3.bf16.msra.mxu0 %v1756_v12 }
 0x9ea   :  { %1725 = vmatprep.subr.bf16.mxu0 %v1850_v0 }
 0x9ed   :  { %1726 = vmatpush3.bf16.msra.mxu0 %v1757_v27 }
 0x9ee   :  { %1727 = vmatprep.subr.bf16.mxu0 %v1850_v0 }
 0x9f1   :  { %1728 = vmatpush3.bf16.msra.mxu0 %v1758_v28 }
 0xab7   :  { %v1206_v46 = vpop.f32.mrb[36].mxu0 }
 0xab8   :  { %v1213_v48 = vadd.f32 %v1206_v46, %v2128_v1  ;;  %v1711_v49 = vpop.f32.mrb[37].mxu0 }
 0xab9   :  { %v1209_v50 = vpop.f32.mrb[38].mxu0 }
 0xaba   :  { %v1222_v51 = vadd.f32 %v1517_v47, %v1213_v48  ;;  %v1214_v52 = vadd.f32 %v1209_v50, %v2131_v6  ;;  %v1712_v53 = vpop.f32.mrb[39].mxu0  ;;  %v1753_v6 = vld [vmem:[#allocation2] sm:$0xff]  }
 0xabb   :  { %1714 = vmatpush3.bf16.msra.mxu1 %v1753_v6  ;;  %v1531_v6 = vld [vmem:[%s2241_s12] ss:$0 sm:$0xff] }
 0xabc   :  { %v2161_v54 = vadd.f32 %v1222_v51, %v1964_v3  ;;  %v1223_v55 = vadd.f32 %v1517_v47, %v1214_v52  ;;  %1715 = vmatprep.subr.bf16.mxu1 %v1850_v0  ;;  %v1524_v0 = vld [vmem:[%s2237_s8] ss:$0 sm:$0xff] }
 0xabe   :  { %v2164_v56 = vadd.f32 %v1223_v55, %v1969_v4  ;;  %v1226_v57 = vsel %vm86_vm1, %v2161_v54, 0.0 }
 0xabf   :  { %1227 = vadd.xlane.f32.xlu0 %v1226_v57  ;;  %1716 = vmatpush3.bf16.msra.mxu1 %v1754_v8 }
 0xac0   :  { %v1229_v58 = vsel %vm86_vm1, %v2164_v56, 0.0 }
 0xac1   :  { %1230 = vadd.xlane.f32.xlu1 %v1229_v58 }
 0xb4c   :  { %v1228_v59 = vpop.xlane.xlu0 %1227 }
 0xb4d   :  { %v1233_v60 = vmul.f32 0.03125, %v1228_v59 }
 0xb4e   :  { %v1231_v61 = vpop.xlane.xlu1 %1230 }
 0xb4f   :  { %v1235_v62 = vsub.f32 %v2161_v54, %v1233_v60  ;;  %v1234_v63 = vmul.f32 0.03125, %v1231_v61 }
 0xb51   :  { %v1236_v3 = vsub.f32 %v2164_v56, %v1234_v63  ;;  %v1237_v1 = vmul.f32 %v1235_v62, %v1235_v62 }
 0xb53   :  { %v1239_v4 = vsel %vm86_vm1, %v1237_v1, 0.0  ;;  %v1238_v2 = vmul.f32 %v1236_v3, %v1236_v3 }
 0xb54   :  { %1240 = vadd.xlane.f32.xlu0 %v1239_v4  ;;  %v1530_v4 = vld [vmem:[%s2240_s11] ss:$0 sm:$0xff] }
 0xb55   :  { %v1242_v5 = vsel %vm86_vm1, %v1238_v2, 0.0 }
 0xb56   :  { %1243 = vadd.xlane.f32.xlu1 %v1242_v5 }
 0xbe1   :  { %v1241_v13 = vpop.xlane.xlu0 %1240 }
 0xbe2   :  { %v1245_v15 = vmul.f32 0.03125, %v1241_v13 }
 0xbe3   :  { %v1244_v16 = vpop.xlane.xlu1 %1243 }
 0xbe4   :  { %v1247_v14 = vadd.f32 1e-05, %v1245_v15  ;;  %v1246_v17 = vmul.f32 0.03125, %v1244_v16 }
 0xbe6   :  { %1791 = vrsqrt.f32 %v1247_v14  ;;  %v1248_v18 = vadd.f32 1e-05, %v1246_v17 }
 0xbe8   :  { %1793 = vrsqrt.f32 %v1248_v18 }
 0xbf0   :  { %v1792_v7 = vpop.eup %1791 }
 0xbf1   :  { %v1251_v10 = vmul.f32 %v1792_v7, %v1235_v62 }
 0xbf2   :  { %v1794_v20 = vpop.eup %1793 }
 0xbf3   :  { %v1260_v21 = vmul.f32 %v1518_v19, %v1251_v10  ;;  %v1252_v22 = vmul.f32 %v1794_v20, %v1236_v3 }
 0xbf5   :  { %v1261_v24 = vmul.f32 %v1518_v19, %v1252_v22  ;;  %v1269_v11 = vadd.f32 %v1519_v23, %v1260_v21 }
 0xbf7   :  { %v1270_v25 = vadd.f32 %v1519_v23, %v1261_v24 }
 0xbf9   :  { %v1271_v26 = vpack.c.bf16 %v1270_v25, %v1269_v11 }
 0xbfb   :  { %1718 = vmatmul.mubr.msk.bf16.vlgmr.msra.gmra.mrb[44].mxu1 %vm86_vm1, %v1271_v26 }
 0xcce   :  { %v1332_v30 = vpop.f32.mrb[44].mxu1 }
 0xccf   :  { %v1333_v31 = vadd.f32 %v1520_v29, %v1332_v30  ;;  %v1719_v32 = vpop.f32.mrb[45].mxu1 }
 0xcd0   :  { %v1335_v33 = vpop.f32.mrb[46].mxu1 }
 0xcd1   :  { %v1336_v34 = vadd.f32 %v1520_v29, %v1335_v33  ;;  %v1720_v35 = vpop.f32.mrb[47].mxu1  ;;  %v1339_v36 = vmax.f32 %v1333_v31, 0.0 }
 0xcd3   :  { %v1340_v37 = vmax.f32 %v1336_v34, 0.0 }
 0xcd5   :  { %v1341_v38 = vpack.c.bf16 %v1340_v37, %v1339_v36 }
 0xcd7   :  { %1730 = vmatmul.mubr.msk.bf16.vlgmr.msra.gmra.mrb[40].mxu0 %vm1381_vm4, %v1341_v38 }
 0xdaa   :  { %v1419_v39 = vpop.f32.mrb[40].mxu0 }
 0xdab   :  { %v1420_v40 = vadd.f32 %v1524_v0, %v1419_v39  ;;  %v1731_v41 = vpop.f32.mrb[41].mxu0 }
 0xdac   :  { %v1422_v42 = vpop.f32.mrb[42].mxu0 }
 0xdad   :  { %v1423_v43 = vadd.f32 %v1524_v0, %v1422_v42  ;;  %v1732_v44 = vpop.f32.mrb[43].mxu0  ;;  %v1426_v45 = vadd.f32 %v1420_v40, %v2161_v54 }
 0xdaf   :  { %v1428_v46 = vsel %vm86_vm1, %v1426_v45, 0.0  ;;  %v1427_v47 = vadd.f32 %v1423_v43, %v2164_v56 }
 0xdb0   :  { %1429 = vadd.xlane.f32.xlu0 %v1428_v46 }
 0xdb1   :  { %v1431_v48 = vsel %vm86_vm1, %v1427_v47, 0.0 }
 0xdb2   :  { %1432 = vadd.xlane.f32.xlu1 %v1431_v48 }
 0xe3d   :  { %v1430_v49 = vpop.xlane.xlu0 %1429 }
 0xe3e   :  { %v1434_v50 = vmul.f32 0.03125, %v1430_v49 }
 0xe3f   :  { %v1433_v51 = vpop.xlane.xlu1 %1432 }
 0xe40   :  { %v1436_v52 = vsub.f32 %v1426_v45, %v1434_v50  ;;  %v1435_v53 = vmul.f32 0.03125, %v1433_v51 }
 0xe42   :  { %v1437_v55 = vsub.f32 %v1427_v47, %v1435_v53  ;;  %v1438_v57 = vmul.f32 %v1436_v52, %v1436_v52 }
 0xe44   :  { %v1440_v58 = vsel %vm86_vm1, %v1438_v57, 0.0  ;;  %v1439_v59 = vmul.f32 %v1437_v55, %v1437_v55 }
 0xe45   :  { %1441 = vadd.xlane.f32.xlu0 %v1440_v58 }
 0xe46   :  { %v1443_v54 = vsel %vm86_vm1, %v1439_v59, 0.0 }
 0xe47   :  { %1444 = vadd.xlane.f32.xlu1 %v1443_v54 }
 0xed2   :  { %v1442_v60 = vpop.xlane.xlu0 %1441 }
 0xed3   :  { %v1446_v56 = vmul.f32 0.03125, %v1442_v60 }
 0xed4   :  { %v1445_v61 = vpop.xlane.xlu1 %1444 }
 0xed5   :  { %v1448_v62 = vadd.f32 1e-05, %v1446_v56  ;;  %v1447_v63 = vmul.f32 0.03125, %v1445_v61 }
 0xed7   :  { %1795 = vrsqrt.f32 %v1448_v62  ;;  %v1449_v3 = vadd.f32 1e-05, %v1447_v63 }
 0xed9   :  { %1797 = vrsqrt.f32 %v1449_v3 }
 0xee1   :  { %v1796_v1 = vpop.eup %1795 }
 0xee2   :  { %v1452_v2 = vmul.f32 %v1796_v1, %v1436_v52 }
 0xee3   :  { %v1798_v5 = vpop.eup %1797 }
 0xee4   :  { %v1461_v8 = vmul.f32 %v1530_v4, %v1452_v2  ;;  %v1453_v9 = vmul.f32 %v1798_v5, %v1437_v55 }
 0xee6   :  { %v1462_v12 = vmul.f32 %v1530_v4, %v1453_v9  ;;  %v1470_v13 = vadd.f32 %v1531_v6, %v1461_v8 }
 0xee8   :  { %v1471_v15 = vadd.f32 %v1531_v6, %v1462_v12  ;;  %1472 = vst.msk [vmem:[#allocation5] sm:$0xff] %vm86_vm1, %v1470_v13 }
 0xeea   :  { %1473 = vst.msk [vmem:[#allocation5 + $0x8] sm:$0xff] %vm86_vm1, %v1471_v15 }
 0xeeb   :  { %1832 = shalt.err (!%p1829_p12)
}
 0xeec   :  { %s1833_s25 = scalar_lea.hbm %s2242_s13, 256 }
 0xeed   :  { %p1834_p13 = scmp.ne.s32.totalorder %s2242_s13, %s1833_s25  ;;  %p1837_p0 = scmp.lt.u32.totalorder %s1833_s25, %s2242_s13 }
 0xeef   :  { %p1839_p1 = pnand %p1837_p0, %p1834_p13 }
 0xef1   :  { %1842 = shalt.err (!%p1839_p1)
}
 0xef2   :  { %s1863_s4 = smov 128   ;;  %s1864_s1 = smov 8  }
 0xef3   :  { %1485 = dma.vmem_to_hbm [thread:$0]  %s1480_s5, 256, %s2242_s13, [#allocation4], %s1863_s4, %s1863_s4, %s1864_s1  }
 0xef4   :  { %1845 = dma.done.wait [#allocation4], 256  }
 0xef5   :  { %1846 = vsyncadd [#allocation4], 4294967040 }
 0xef6   :  { %1489 = vsyncpa [#allocation3], 1 }
 0xef7   :  { %1490 = vsyncpa [#allocation4], 1 }

</bundles_post_ra>
